<compile_context>
chip_gen: v6e
topology: v6e:2x2x1
jax: 0.10.0
libtpu: 0.0.40
codegen_flags: <defaults>
</compile_context>

<pallas_src>
import jax
import jax.numpy as jnp
from jax.experimental import pallas as pl
from jax.experimental.pallas import tpu as pltpu

EPS = 1e-5      # nn.BatchNorm2d default eps
LANES = 128     # TPU lane width


# ---------------------------------------------------------------------------
# Helpers
# ---------------------------------------------------------------------------
def _round_up(x, m):
    return ((x + m - 1) // m) * m


def _pick_row_tile(H, W):
    """Rows of output per grid step; aim for ~128 rows in the (TH*W, Cin) LHS."""
    target = max(1, 128 // max(W, 1))
    th = 1
    for cand in range(1, H + 1):
        if H % cand == 0 and cand <= target:
            th = cand
    return th


def _pick_m_tile(M):
    """Row tile for the elementwise BN+ReLU pass (v7x-VMEM-safe, pipelined)."""
    for cand in (256, 128, 64, 32, 16, 8):
        if M % cand == 0:
            return cand
    return M


# ---------------------------------------------------------------------------
# Kernel 1: 3x3 conv (9 tap matmuls) + per-tile BN partial statistics.
# ---------------------------------------------------------------------------
def _make_conv_kernel(TH, W, Cin_p, Cp):
    def kernel(x_ref, w_ref, o_ref, stats_ref):
        # x_ref:     (1, H+2, W+2, Cin_p) spatially padded image for this batch
        #            element (block index constant across row tiles -> the DMA
        #            is reused, not repeated).
        # w_ref:     (3, 3, Cin_p, Cp) conv weight, channel-padded.
        # o_ref:     (1, TH, W, Cp) raw (pre-BN, bias-free) conv output tile.
        # stats_ref: (1, 1, 2, Cp) per-tile partial (sum, sum_of_squares).
        r = pl.program_id(1)
        row0 = r * TH

        acc = None
        for ky in range(3):
            for kx in range(3):
                xs = x_ref[0, pl.ds(row0 + ky, TH), pl.ds(kx, W), :]   # (TH, W, Cin_p)
                lhs = xs.reshape(TH * W, Cin_p)
                rhs = w_ref[ky, kx]                                    # (Cin_p, Cp)
                part = jnp.dot(lhs, rhs, preferred_element_type=jnp.float32)
                acc = part if acc is None else acc + part

        o_ref[...] = acc.reshape(1, TH, W, Cp)
        stats_ref[0, 0, 0:1, :] = jnp.sum(acc, axis=0, keepdims=True)
        stats_ref[0, 0, 1:2, :] = jnp.sum(acc * acc, axis=0, keepdims=True)

    return kernel


def _conv_raw_and_stats(xpad, w4, TH):
    N, Hp2, Wp2, Cin_p = xpad.shape
    H, W = Hp2 - 2, Wp2 - 2
    Cp = w4.shape[-1]
    R = H // TH

    flops = 2 * N * H * W * 9 * Cin_p * Cp
    bytes_accessed = 4 * (xpad.size + w4.size + N * H * W * Cp + N * R * 2 * Cp)

    conv_raw, stats = pl.pallas_call(
        _make_conv_kernel(TH, W, Cin_p, Cp),
        out_shape=(
            jax.ShapeDtypeStruct((N, H, W, Cp), jnp.float32),
            jax.ShapeDtypeStruct((N, R, 2, Cp), jnp.float32),
        ),
        grid=(N, R),
        in_specs=[
            pl.BlockSpec((1, Hp2, Wp2, Cin_p), lambda n, r: (n, 0, 0, 0)),
            pl.BlockSpec((3, 3, Cin_p, Cp), lambda n, r: (0, 0, 0, 0)),
        ],
        out_specs=(
            pl.BlockSpec((1, TH, W, Cp), lambda n, r: (n, r, 0, 0)),
            pl.BlockSpec((1, 1, 2, Cp), lambda n, r: (n, r, 0, 0)),
        ),
        compiler_params=pltpu.CompilerParams(
            dimension_semantics=("parallel", "parallel"),
            vmem_limit_bytes=32 * 1024 * 1024,   # safe on v7x (64 MiB) as well
        ),
        cost_estimate=pl.CostEstimate(
            flops=flops, transcendentals=0, bytes_accessed=bytes_accessed),
    )(xpad, w4)
    return conv_raw, stats


# ---------------------------------------------------------------------------
# Kernel 2: BN apply (single fused scale/shift) + ReLU, tiled over rows.
# ---------------------------------------------------------------------------
def _bn_relu_kernel(x_ref, scale_ref, shift_ref, o_ref):
    o_ref[...] = jnp.maximum(x_ref[...] * scale_ref[...] + shift_ref[...], 0.0)


def _bn_relu_apply(x2d, scale, shift):
    M, Cp = x2d.shape
    TM = _pick_m_tile(M)
    return pl.pallas_call(
        _bn_relu_kernel,
        out_shape=jax.ShapeDtypeStruct((M, Cp), jnp.float32),
        grid=(M // TM,),
        in_specs=[
            pl.BlockSpec((TM, Cp), lambda i: (i, 0)),
            pl.BlockSpec((1, Cp), lambda i: (0, 0)),
            pl.BlockSpec((1, Cp), lambda i: (0, 0)),
        ],
        out_specs=pl.BlockSpec((TM, Cp), lambda i: (i, 0)),
        compiler_params=pltpu.CompilerParams(
            dimension_semantics=("parallel",)),
    )(x2d, scale, shift)


# ---------------------------------------------------------------------------
# One Conv3x3 -> BatchNorm2d(train) -> ReLU block (channel-padded NHWC in/out).
# ---------------------------------------------------------------------------
def _conv_bn_relu_block(x_nhwc_p, w_oihw, gamma, beta):
    N, H, W, Cin_p = x_nhwc_p.shape
    Cout, Cin = int(w_oihw.shape[0]), int(w_oihw.shape[1])
    Cp = _round_up(Cout, LANES)

    # OIHW -> (kH, kW, Cin, Cout), zero-padded to lane-dense channel counts.
    w4 = jnp.transpose(w_oihw, (2, 3, 1, 0)).astype(jnp.float32)
    w4 = jnp.pad(w4, ((0, 0), (0, 0), (0, Cin_p - Cin), (0, Cp - Cout)))

    # Spatial zero padding (pad=1) done once; the kernel reads shifted windows.
    xpad = jnp.pad(x_nhwc_p, ((0, 0), (1, 1), (1, 1), (0, 0)))
    TH = _pick_row_tile(H, W)
    conv_raw, stats = _conv_raw_and_stats(xpad, w4, TH)

    # Batch statistics (PyTorch training-mode BN: biased variance over N,H,W).
    # NOTE: the Conv2d bias is intentionally never added — it cancels exactly
    # in (x - mean(x)), so the BN output is identical without it.
    m_total = float(N * H * W)
    ssum = jnp.sum(stats[:, :, 0, :], axis=(0, 1))            # (Cp,)
    ssq = jnp.sum(stats[:, :, 1, :], axis=(0, 1))             # (Cp,)
    mean = ssum / m_total
    var = jnp.maximum(ssq / m_total - mean * mean, 0.0)       # biased, clamped

    g_p = jnp.pad(gamma.astype(jnp.float32), (0, Cp - Cout))
    b_p = jnp.pad(beta.astype(jnp.float32), (0, Cp - Cout))
    scale = g_p * jax.lax.rsqrt(var + EPS)                    # gamma * inv_std
    shift = b_p - mean * scale

    y2d = _bn_relu_apply(conv_raw.reshape(N * H * W, Cp),
                         scale.reshape(1, Cp), shift.reshape(1, Cp))
    return y2d.reshape(N, H, W, Cp)


@jax.jit
def double_conv(x_nchw, params):
    """Forward pass equivalent to DoubleConv(in_ch, out_ch)(x) in training mode."""
    N, Cin, H, W = x_nchw.shape
    Cin_p = _round_up(Cin, LANES)
    x = jnp.transpose(x_nchw, (0, 2, 3, 1)).astype(jnp.float32)   # NCHW -> NHWC
    x = jnp.pad(x, ((0, 0), (0, 0), (0, 0), (0, Cin_p - Cin)))    # lane-dense C

    y = _conv_bn_relu_block(x, params["w1"], params["g1"], params["beta1"])
    # TODO(synk): further fusion — apply block-1's scale/shift/ReLU inside the
    # block-2 conv kernel to skip one activation HBM round trip.
    y = _conv_bn_relu_block(y, params["w2"], params["g2"], params["beta2"])

    Cout = params["w1"].shape[0]
    return jnp.transpose(y[:, :, :, :Cout], (0, 3, 1, 2))          # NHWC -> NCHW


# ---------------------------------------------------------------------------
# Pure-JAX reference (includes the conv biases, proving they cancel under BN).
# ---------------------------------------------------------------------------
def ref_double_conv(x_nchw, params):
    def block(x, w, b, g, be):
        y = jax.lax.conv_general_dilated(
            x, w, window_strides=(1, 1), padding="SAME",
            dimension_numbers=("NCHW", "OIHW", "NCHW"))
        y = y + b[None, :, None, None]
        mean = jnp.mean(y, axis=(0, 2, 3), keepdims=True)
        var = jnp.mean((y - mean) ** 2, axis=(0, 2, 3), keepdims=True)
        y = (y - mean) * jax.lax.rsqrt(var + EPS)
        y = y * g[None, :, None, None] + be[None, :, None, None]
        return jnp.maximum(y, 0.0)

    y = block(x_nchw, params["w1"], params["b1"], params["g1"], params["beta1"])
    y = block(y, params["w2"], params["b2"], params["g2"], params["beta2"])
    return y


# ---------------------------------------------------------------------------
# Deterministic parameter init (shapes from DoubleConv.__init__).
# ---------------------------------------------------------------------------
def init_params(key, in_ch, out_ch):
    ks = jax.random.split(key, 8)

    def conv_init(kw, kb, cin, cout):
        fan_in = cin * 3 * 3
        bound = 1.0 / jnp.sqrt(fan_in)
        w = jax.random.uniform(kw, (cout, cin, 3, 3), jnp.float32, -bound, bound)
        b = jax.random.uniform(kb, (cout,), jnp.float32, -bound, bound)
        return w, b

    w1, b1 = conv_init(ks[0], ks[1], in_ch, out_ch)
    w2, b2 = conv_init(ks[2], ks[3], out_ch, out_ch)
    g1 = 1.0 + 0.1 * jax.random.normal(ks[4], (out_ch,), jnp.float32)
    beta1 = 0.1 * jax.random.normal(ks[5], (out_ch,), jnp.float32)
    g2 = 1.0 + 0.1 * jax.random.normal(ks[6], (out_ch,), jnp.float32)
    beta2 = 0.1 * jax.random.normal(ks[7], (out_ch,), jnp.float32)
    return dict(w1=w1, b1=b1, g1=g1, beta1=beta1,
                w2=w2, b2=b2, g2=g2, beta2=beta2)


if __name__ == "__main__":
    N, Cin, Cout, H, W = 2, 4, 8, 16, 16

    key = jax.random.PRNGKey(0)
    kx_, kp = jax.random.split(key)
    x = jax.random.normal(kx_, (N, Cin, H, W), jnp.float32)
    params = init_params(kp, Cin, Cout)

    out = jax.block_until_ready(double_conv(x, params))
    ref = jax.block_until_ready(ref_double_conv(x, params))

    max_err = float(jnp.max(jnp.abs(out - ref)))
    assert out.shape == (N, Cout, H, W), out.shape
    # Default (single-pass MXU) matmul precision instead of HIGHEST; BN
    # renormalizes, so a 3e-2 absolute tolerance on O(1) outputs is ample.
    assert max_err < 3e-2, f"max abs error {max_err}"

    print("KERNEL_OK")
</pallas_src>

<mosaic_0001>
module attributes {stable_mosaic.version = 11 : i64} {
  func.func @kernel(%arg0: i32, %arg1: i32, %arg2: memref<1x18x18x128xf32, #tpu.memory_space<vmem>>, %arg3: memref<3x3x128x128xf32, #tpu.memory_space<vmem>>, %arg4: memref<1x8x16x128xf32, #tpu.memory_space<vmem>>, %arg5: memref<1x1x2x128xf32, #tpu.memory_space<vmem>>) attributes {dimension_semantics = [#tpu.dimension_semantics<parallel>, #tpu.dimension_semantics<parallel>], iteration_bounds = array<i64: 2, 2>, scalar_prefetch = 0 : i64, scratch_operands = 0 : i64, tpu.core_type = #tpu.core_type<tc>, window_params = [{transform_indices = @transform_0, window_bounds = array<i64: 1, 18, 18, 128>}, {pipeline_mode = #tpu.pipeline_mode<synchronous>, transform_indices = @transform_1, window_bounds = array<i64: 3, 3, 128, 128>}, {transform_indices = @transform_2, window_bounds = array<i64: 1, 8, 16, 128>}, {transform_indices = @transform_3, window_bounds = array<i64: 1, 1, 2, 128>}]} {
    %c8_i32 = arith.constant 8 : i32
    %0 = arith.muli %arg1, %c8_i32 : i32
    %c0_i32 = arith.constant 0 : i32
    %1 = arith.addi %0, %c0_i32 : i32
    %c0 = arith.constant 0 : index
    %2 = arith.index_cast %1 : i32 to index
    %c0_0 = arith.constant 0 : index
    %c0_1 = arith.constant 0 : index
    %3 = vector.load %arg2[%c0, %2, %c0_0, %c0_1] : memref<1x18x18x128xf32, #tpu.memory_space<vmem>>, vector<1x8x16x128xf32>
    %4 = vector.shape_cast %3 : vector<1x8x16x128xf32> to vector<8x16x128xf32>
    %5 = vector.shape_cast %4 : vector<8x16x128xf32> to vector<128x128xf32>
    %c0_2 = arith.constant 0 : index
    %c0_3 = arith.constant 0 : index
    %c0_4 = arith.constant 0 : index
    %c0_5 = arith.constant 0 : index
    %6 = vector.load %arg3[%c0_2, %c0_3, %c0_4, %c0_5] : memref<3x3x128x128xf32, #tpu.memory_space<vmem>>, vector<1x1x128x128xf32>
    %7 = vector.shape_cast %6 : vector<1x1x128x128xf32> to vector<128x128xf32>
    %cst = arith.constant dense<0.000000e+00> : vector<128x128xf32>
    %8 = tpu.matmul %5, %7, %cst {dimension_numbers = #tpu.dot_dimension_numbers<[1], [0], [0], [1], [0, 0, 1, 1], [], []>} : vector<128x128xf32>, vector<128x128xf32>, vector<128x128xf32> -> vector<128x128xf32>
    %c0_i32_6 = arith.constant 0 : i32
    %9 = arith.addi %0, %c0_i32_6 : i32
    %c0_7 = arith.constant 0 : index
    %10 = arith.index_cast %9 : i32 to index
    %c1 = arith.constant 1 : index
    %c0_8 = arith.constant 0 : index
    %11 = vector.load %arg2[%c0_7, %10, %c1, %c0_8] : memref<1x18x18x128xf32, #tpu.memory_space<vmem>>, vector<1x8x16x128xf32>
    %12 = vector.shape_cast %11 : vector<1x8x16x128xf32> to vector<8x16x128xf32>
    %13 = vector.shape_cast %12 : vector<8x16x128xf32> to vector<128x128xf32>
    %c0_9 = arith.constant 0 : index
    %c1_10 = arith.constant 1 : index
    %c0_11 = arith.constant 0 : index
    %c0_12 = arith.constant 0 : index
    %14 = vector.load %arg3[%c0_9, %c1_10, %c0_11, %c0_12] : memref<3x3x128x128xf32, #tpu.memory_space<vmem>>, vector<1x1x128x128xf32>
    %15 = vector.shape_cast %14 : vector<1x1x128x128xf32> to vector<128x128xf32>
    %cst_13 = arith.constant dense<0.000000e+00> : vector<128x128xf32>
    %16 = tpu.matmul %13, %15, %cst_13 {dimension_numbers = #tpu.dot_dimension_numbers<[1], [0], [0], [1], [0, 0, 1, 1], [], []>} : vector<128x128xf32>, vector<128x128xf32>, vector<128x128xf32> -> vector<128x128xf32>
    %17 = arith.addf %8, %16 : vector<128x128xf32>
    %c0_i32_14 = arith.constant 0 : i32
    %18 = arith.addi %0, %c0_i32_14 : i32
    %c0_15 = arith.constant 0 : index
    %19 = arith.index_cast %18 : i32 to index
    %c2 = arith.constant 2 : index
    %c0_16 = arith.constant 0 : index
    %20 = vector.load %arg2[%c0_15, %19, %c2, %c0_16] : memref<1x18x18x128xf32, #tpu.memory_space<vmem>>, vector<1x8x16x128xf32>
    %21 = vector.shape_cast %20 : vector<1x8x16x128xf32> to vector<8x16x128xf32>
    %22 = vector.shape_cast %21 : vector<8x16x128xf32> to vector<128x128xf32>
    %c0_17 = arith.constant 0 : index
    %c2_18 = arith.constant 2 : index
    %c0_19 = arith.constant 0 : index
    %c0_20 = arith.constant 0 : index
    %23 = vector.load %arg3[%c0_17, %c2_18, %c0_19, %c0_20] : memref<3x3x128x128xf32, #tpu.memory_space<vmem>>, vector<1x1x128x128xf32>
    %24 = vector.shape_cast %23 : vector<1x1x128x128xf32> to vector<128x128xf32>
    %cst_21 = arith.constant dense<0.000000e+00> : vector<128x128xf32>
    %25 = tpu.matmul %22, %24, %cst_21 {dimension_numbers = #tpu.dot_dimension_numbers<[1], [0], [0], [1], [0, 0, 1, 1], [], []>} : vector<128x128xf32>, vector<128x128xf32>, vector<128x128xf32> -> vector<128x128xf32>
    %26 = arith.addf %17, %25 : vector<128x128xf32>
    %c1_i32 = arith.constant 1 : i32
    %27 = arith.addi %0, %c1_i32 : i32
    %c0_22 = arith.constant 0 : index
    %28 = arith.index_cast %27 : i32 to index
    %c0_23 = arith.constant 0 : index
    %c0_24 = arith.constant 0 : index
    %29 = vector.load %arg2[%c0_22, %28, %c0_23, %c0_24] : memref<1x18x18x128xf32, #tpu.memory_space<vmem>>, vector<1x8x16x128xf32>
    %30 = vector.shape_cast %29 : vector<1x8x16x128xf32> to vector<8x16x128xf32>
    %31 = vector.shape_cast %30 : vector<8x16x128xf32> to vector<128x128xf32>
    %c1_25 = arith.constant 1 : index
    %c0_26 = arith.constant 0 : index
    %c0_27 = arith.constant 0 : index
    %c0_28 = arith.constant 0 : index
    %32 = vector.load %arg3[%c1_25, %c0_26, %c0_27, %c0_28] : memref<3x3x128x128xf32, #tpu.memory_space<vmem>>, vector<1x1x128x128xf32>
    %33 = vector.shape_cast %32 : vector<1x1x128x128xf32> to vector<128x128xf32>
    %cst_29 = arith.constant dense<0.000000e+00> : vector<128x128xf32>
    %34 = tpu.matmul %31, %33, %cst_29 {dimension_numbers = #tpu.dot_dimension_numbers<[1], [0], [0], [1], [0, 0, 1, 1], [], []>} : vector<128x128xf32>, vector<128x128xf32>, vector<128x128xf32> -> vector<128x128xf32>
    %35 = arith.addf %26, %34 : vector<128x128xf32>
    %c1_i32_30 = arith.constant 1 : i32
    %36 = arith.addi %0, %c1_i32_30 : i32
    %c0_31 = arith.constant 0 : index
    %37 = arith.index_cast %36 : i32 to index
    %c1_32 = arith.constant 1 : index
    %c0_33 = arith.constant 0 : index
    %38 = vector.load %arg2[%c0_31, %37, %c1_32, %c0_33] : memref<1x18x18x128xf32, #tpu.memory_space<vmem>>, vector<1x8x16x128xf32>
    %39 = vector.shape_cast %38 : vector<1x8x16x128xf32> to vector<8x16x128xf32>
    %40 = vector.shape_cast %39 : vector<8x16x128xf32> to vector<128x128xf32>
    %c1_34 = arith.constant 1 : index
    %c1_35 = arith.constant 1 : index
    %c0_36 = arith.constant 0 : index
    %c0_37 = arith.constant 0 : index
    %41 = vector.load %arg3[%c1_34, %c1_35, %c0_36, %c0_37] : memref<3x3x128x128xf32, #tpu.memory_space<vmem>>, vector<1x1x128x128xf32>
    %42 = vector.shape_cast %41 : vector<1x1x128x128xf32> to vector<128x128xf32>
    %cst_38 = arith.constant dense<0.000000e+00> : vector<128x128xf32>
    %43 = tpu.matmul %40, %42, %cst_38 {dimension_numbers = #tpu.dot_dimension_numbers<[1], [0], [0], [1], [0, 0, 1, 1], [], []>} : vector<128x128xf32>, vector<128x128xf32>, vector<128x128xf32> -> vector<128x128xf32>
    %44 = arith.addf %35, %43 : vector<128x128xf32>
    %c1_i32_39 = arith.constant 1 : i32
    %45 = arith.addi %0, %c1_i32_39 : i32
    %c0_40 = arith.constant 0 : index
    %46 = arith.index_cast %45 : i32 to index
    %c2_41 = arith.constant 2 : index
    %c0_42 = arith.constant 0 : index
    %47 = vector.load %arg2[%c0_40, %46, %c2_41, %c0_42] : memref<1x18x18x128xf32, #tpu.memory_space<vmem>>, vector<1x8x16x128xf32>
    %48 = vector.shape_cast %47 : vector<1x8x16x128xf32> to vector<8x16x128xf32>
    %49 = vector.shape_cast %48 : vector<8x16x128xf32> to vector<128x128xf32>
    %c1_43 = arith.constant 1 : index
    %c2_44 = arith.constant 2 : index
    %c0_45 = arith.constant 0 : index
    %c0_46 = arith.constant 0 : index
    %50 = vector.load %arg3[%c1_43, %c2_44, %c0_45, %c0_46] : memref<3x3x128x128xf32, #tpu.memory_space<vmem>>, vector<1x1x128x128xf32>
    %51 = vector.shape_cast %50 : vector<1x1x128x128xf32> to vector<128x128xf32>
    %cst_47 = arith.constant dense<0.000000e+00> : vector<128x128xf32>
    %52 = tpu.matmul %49, %51, %cst_47 {dimension_numbers = #tpu.dot_dimension_numbers<[1], [0], [0], [1], [0, 0, 1, 1], [], []>} : vector<128x128xf32>, vector<128x128xf32>, vector<128x128xf32> -> vector<128x128xf32>
    %53 = arith.addf %44, %52 : vector<128x128xf32>
    %c2_i32 = arith.constant 2 : i32
    %54 = arith.addi %0, %c2_i32 : i32
    %c0_48 = arith.constant 0 : index
    %55 = arith.index_cast %54 : i32 to index
    %c0_49 = arith.constant 0 : index
    %c0_50 = arith.constant 0 : index
    %56 = vector.load %arg2[%c0_48, %55, %c0_49, %c0_50] : memref<1x18x18x128xf32, #tpu.memory_space<vmem>>, vector<1x8x16x128xf32>
    %57 = vector.shape_cast %56 : vector<1x8x16x128xf32> to vector<8x16x128xf32>
    %58 = vector.shape_cast %57 : vector<8x16x128xf32> to vector<128x128xf32>
    %c2_51 = arith.constant 2 : index
    %c0_52 = arith.constant 0 : index
    %c0_53 = arith.constant 0 : index
    %c0_54 = arith.constant 0 : index
    %59 = vector.load %arg3[%c2_51, %c0_52, %c0_53, %c0_54] : memref<3x3x128x128xf32, #tpu.memory_space<vmem>>, vector<1x1x128x128xf32>
    %60 = vector.shape_cast %59 : vector<1x1x128x128xf32> to vector<128x128xf32>
    %cst_55 = arith.constant dense<0.000000e+00> : vector<128x128xf32>
    %61 = tpu.matmul %58, %60, %cst_55 {dimension_numbers = #tpu.dot_dimension_numbers<[1], [0], [0], [1], [0, 0, 1, 1], [], []>} : vector<128x128xf32>, vector<128x128xf32>, vector<128x128xf32> -> vector<128x128xf32>
    %62 = arith.addf %53, %61 : vector<128x128xf32>
    %c2_i32_56 = arith.constant 2 : i32
    %63 = arith.addi %0, %c2_i32_56 : i32
    %c0_57 = arith.constant 0 : index
    %64 = arith.index_cast %63 : i32 to index
    %c1_58 = arith.constant 1 : index
    %c0_59 = arith.constant 0 : index
    %65 = vector.load %arg2[%c0_57, %64, %c1_58, %c0_59] : memref<1x18x18x128xf32, #tpu.memory_space<vmem>>, vector<1x8x16x128xf32>
    %66 = vector.shape_cast %65 : vector<1x8x16x128xf32> to vector<8x16x128xf32>
    %67 = vector.shape_cast %66 : vector<8x16x128xf32> to vector<128x128xf32>
    %c2_60 = arith.constant 2 : index
    %c1_61 = arith.constant 1 : index
    %c0_62 = arith.constant 0 : index
    %c0_63 = arith.constant 0 : index
    %68 = vector.load %arg3[%c2_60, %c1_61, %c0_62, %c0_63] : memref<3x3x128x128xf32, #tpu.memory_space<vmem>>, vector<1x1x128x128xf32>
    %69 = vector.shape_cast %68 : vector<1x1x128x128xf32> to vector<128x128xf32>
    %cst_64 = arith.constant dense<0.000000e+00> : vector<128x128xf32>
    %70 = tpu.matmul %67, %69, %cst_64 {dimension_numbers = #tpu.dot_dimension_numbers<[1], [0], [0], [1], [0, 0, 1, 1], [], []>} : vector<128x128xf32>, vector<128x128xf32>, vector<128x128xf32> -> vector<128x128xf32>
    %71 = arith.addf %62, %70 : vector<128x128xf32>
    %c2_i32_65 = arith.constant 2 : i32
    %72 = arith.addi %0, %c2_i32_65 : i32
    %c0_66 = arith.constant 0 : index
    %73 = arith.index_cast %72 : i32 to index
    %c2_67 = arith.constant 2 : index
    %c0_68 = arith.constant 0 : index
    %74 = vector.load %arg2[%c0_66, %73, %c2_67, %c0_68] : memref<1x18x18x128xf32, #tpu.memory_space<vmem>>, vector<1x8x16x128xf32>
    %75 = vector.shape_cast %74 : vector<1x8x16x128xf32> to vector<8x16x128xf32>
    %76 = vector.shape_cast %75 : vector<8x16x128xf32> to vector<128x128xf32>
    %c2_69 = arith.constant 2 : index
    %c2_70 = arith.constant 2 : index
    %c0_71 = arith.constant 0 : index
    %c0_72 = arith.constant 0 : index
    %77 = vector.load %arg3[%c2_69, %c2_70, %c0_71, %c0_72] : memref<3x3x128x128xf32, #tpu.memory_space<vmem>>, vector<1x1x128x128xf32>
    %78 = vector.shape_cast %77 : vector<1x1x128x128xf32> to vector<128x128xf32>
    %cst_73 = arith.constant dense<0.000000e+00> : vector<128x128xf32>
    %79 = tpu.matmul %76, %78, %cst_73 {dimension_numbers = #tpu.dot_dimension_numbers<[1], [0], [0], [1], [0, 0, 1, 1], [], []>} : vector<128x128xf32>, vector<128x128xf32>, vector<128x128xf32> -> vector<128x128xf32>
    %80 = arith.addf %71, %79 : vector<128x128xf32>
    %81 = vector.shape_cast %80 : vector<128x128xf32> to vector<1x8x16x128xf32>
    %c0_74 = arith.constant 0 : index
    %c0_75 = arith.constant 0 : index
    %c0_76 = arith.constant 0 : index
    %c0_77 = arith.constant 0 : index
    %82 = vector.load %arg4[%c0_74, %c0_75, %c0_76, %c0_77] : memref<1x8x16x128xf32, #tpu.memory_space<vmem>>, vector<1x8x16x128xf32>
    tpu.vector_store %arg4[%c0_74, %c0_75, %c0_76, %c0_77], %81 {strides = array<i32>} : memref<1x8x16x128xf32, #tpu.memory_space<vmem>>, vector<1x8x16x128xf32>,
    %cst_78 = arith.constant dense<0.000000e+00> : vector<128xf32>
    %83 = vector.multi_reduction <add>, %80, %cst_78 [0] : vector<128x128xf32> to vector<128xf32>
    %84 = vector.shape_cast %83 : vector<128xf32> to vector<1x128xf32>
    %c0_79 = arith.constant 0 : index
    %c0_80 = arith.constant 0 : index
    %c0_81 = arith.constant 0 : index
    %c0_82 = arith.constant 0 : index
    %85 = vector.load %arg5[%c0_79, %c0_80, %c0_81, %c0_82] : memref<1x1x2x128xf32, #tpu.memory_space<vmem>>, vector<1x1x1x128xf32>
    %86 = vector.shape_cast %85 : vector<1x1x1x128xf32> to vector<1x128xf32>
    %87 = vector.shape_cast %84 : vector<1x128xf32> to vector<1x1x1x128xf32>
    tpu.vector_store %arg5[%c0_79, %c0_80, %c0_81, %c0_82], %87 {strides = array<i32>} : memref<1x1x2x128xf32, #tpu.memory_space<vmem>>, vector<1x1x1x128xf32>,
    %88 = arith.mulf %80, %80 : vector<128x128xf32>
    %cst_83 = arith.constant dense<0.000000e+00> : vector<128xf32>
    %89 = vector.multi_reduction <add>, %88, %cst_83 [0] : vector<128x128xf32> to vector<128xf32>
    %90 = vector.shape_cast %89 : vector<128xf32> to vector<1x128xf32>
    %c0_84 = arith.constant 0 : index
    %c0_85 = arith.constant 0 : index
    %c1_86 = arith.constant 1 : index
    %c0_87 = arith.constant 0 : index
    %91 = vector.load %arg5[%c0_84, %c0_85, %c1_86, %c0_87] : memref<1x1x2x128xf32, #tpu.memory_space<vmem>>, vector<1x1x1x128xf32>
    %92 = vector.shape_cast %91 : vector<1x1x1x128xf32> to vector<1x128xf32>
    %93 = vector.shape_cast %90 : vector<1x128xf32> to vector<1x1x1x128xf32>
    tpu.vector_store %arg5[%c0_84, %c0_85, %c1_86, %c0_87], %93 {strides = array<i32>} : memref<1x1x2x128xf32, #tpu.memory_space<vmem>>, vector<1x1x1x128xf32>,
    return
  }
  func.func @transform_0(%arg0: i32, %arg1: i32) -> (i32, i32, i32, i32) {
    %c0_i32 = arith.constant 0 : i32
    %c0_i32_0 = arith.constant 0 : i32
    %c0_i32_1 = arith.constant 0 : i32
    %c0_i32_2 = arith.constant 0 : i32
    return %arg0, %c0_i32, %c0_i32_0, %c0_i32_1 : i32, i32, i32, i32
  }
  func.func @transform_1(%arg0: i32, %arg1: i32) -> (i32, i32, i32, i32) {
    %c0_i32 = arith.constant 0 : i32
    %c0_i32_0 = arith.constant 0 : i32
    %c0_i32_1 = arith.constant 0 : i32
    %c0_i32_2 = arith.constant 0 : i32
    %c0_i32_3 = arith.constant 0 : i32
    return %c0_i32, %c0_i32_0, %c0_i32_1, %c0_i32_2 : i32, i32, i32, i32
  }
  func.func @transform_2(%arg0: i32, %arg1: i32) -> (i32, i32, i32, i32) {
    %c0_i32 = arith.constant 0 : i32
    %c0_i32_0 = arith.constant 0 : i32
    %c0_i32_1 = arith.constant 0 : i32
    return %arg0, %arg1, %c0_i32, %c0_i32_0 : i32, i32, i32, i32
  }
  func.func @transform_3(%arg0: i32, %arg1: i32) -> (i32, i32, i32, i32) {
    %c0_i32 = arith.constant 0 : i32
    %c0_i32_0 = arith.constant 0 : i32
    %c0_i32_1 = arith.constant 0 : i32
    return %arg0, %arg1, %c0_i32, %c0_i32_0 : i32, i32, i32, i32
  }
}

module attributes {stable_mosaic.version = 11 : i64} {
  func.func @_bn_relu_kernel(%arg0: i32, %arg1: memref<256x128xf32, #tpu.memory_space<vmem>>, %arg2: memref<1x128xf32, #tpu.memory_space<vmem>>, %arg3: memref<1x128xf32, #tpu.memory_space<vmem>>, %arg4: memref<256x128xf32, #tpu.memory_space<vmem>>) attributes {dimension_semantics = [#tpu.dimension_semantics<parallel>], iteration_bounds = array<i64: 2>, scalar_prefetch = 0 : i64, scratch_operands = 0 : i64, tpu.core_type = #tpu.core_type<tc>, window_params = [{transform_indices = @transform_0, window_bounds = array<i64: 256, 128>}, {pipeline_mode = #tpu.pipeline_mode<synchronous>, transform_indices = @transform_1, window_bounds = array<i64: 1, 128>}, {pipeline_mode = #tpu.pipeline_mode<synchronous>, transform_indices = @transform_2, window_bounds = array<i64: 1, 128>}, {transform_indices = @transform_3, window_bounds = array<i64: 256, 128>}]} {
    %c0 = arith.constant 0 : index
    %c0_0 = arith.constant 0 : index
    %0 = vector.load %arg1[%c0, %c0_0] : memref<256x128xf32, #tpu.memory_space<vmem>>, vector<256x128xf32>
    %c0_1 = arith.constant 0 : index
    %c0_2 = arith.constant 0 : index
    %1 = vector.load %arg2[%c0_1, %c0_2] : memref<1x128xf32, #tpu.memory_space<vmem>>, vector<1x128xf32>
    %2 = vector.broadcast %1 : vector<1x128xf32> to vector<256x128xf32>
    %3 = arith.mulf %0, %2 : vector<256x128xf32>
    %c0_3 = arith.constant 0 : index
    %c0_4 = arith.constant 0 : index
    %4 = vector.load %arg3[%c0_3, %c0_4] : memref<1x128xf32, #tpu.memory_space<vmem>>, vector<1x128xf32>
    %5 = vector.broadcast %4 : vector<1x128xf32> to vector<256x128xf32>
    %6 = arith.addf %3, %5 : vector<256x128xf32>
    %cst = arith.constant 0.000000e+00 : f32
    %7 = vector.broadcast %cst : f32 to vector<256x128xf32>
    %8 = arith.maximumf %6, %7 : vector<256x128xf32>
    %c0_5 = arith.constant 0 : index
    %c0_6 = arith.constant 0 : index
    %9 = vector.load %arg4[%c0_5, %c0_6] : memref<256x128xf32, #tpu.memory_space<vmem>>, vector<256x128xf32>
    tpu.vector_store %arg4[%c0_5, %c0_6], %8 {strides = array<i32>} : memref<256x128xf32, #tpu.memory_space<vmem>>, vector<256x128xf32>,
    return
  }
  func.func @transform_0(%arg0: i32) -> (i32, i32) {
    %c0_i32 = arith.constant 0 : i32
    %c0_i32_0 = arith.constant 0 : i32
    return %arg0, %c0_i32 : i32, i32
  }
  func.func @transform_1(%arg0: i32) -> (i32, i32) {
    %c0_i32 = arith.constant 0 : i32
    %c0_i32_0 = arith.constant 0 : i32
    %c0_i32_1 = arith.constant 0 : i32
    return %c0_i32, %c0_i32_0 : i32, i32
  }
  func.func @transform_2(%arg0: i32) -> (i32, i32) {
    %c0_i32 = arith.constant 0 : i32
    %c0_i32_0 = arith.constant 0 : i32
    %c0_i32_1 = arith.constant 0 : i32
    return %c0_i32, %c0_i32_0 : i32, i32
  }
  func.func @transform_3(%arg0: i32) -> (i32, i32) {
    %c0_i32 = arith.constant 0 : i32
    %c0_i32_0 = arith.constant 0 : i32
    return %arg0, %c0_i32 : i32, i32
  }
}

</mosaic_0001>

<bundles_post_ra>
// kernel: double_conv.5
= control target key start
LH: loop header
LB: loop body
LE: loop exit
PB: predicated region body
PF: predicated region fallthrough
CT: control target
= control target key end

     0   :  { %s453_s12 = smov 0   ;;  %s612_s0 = inlined_call_operand.vmem [shape: f32[512,128], index: 0, kind: input, shape index: {}]   ;;  %s613_s1 = inlined_call_operand.vmem [shape: f32[1,128], index: 1, kind: input, shape index: {}]   ;;  %s614_s2 = inlined_call_operand.vmem [shape: f32[1,128], index: 2, kind: input, shape index: {}]   ;;  %s615_s3 = inlined_call_operand.vmem [shape: f32[512,128], index: 3, kind: output, shape index: {}]  }
   0x1 LB: > { %s404_s13 = sadd.s32 4294967295, %s431_s12   ;;  %p408_p0 = scmp.ge.s32.totalorder %s431_s12, 1  ;;  %s431_s12 = sphi %s453_s12, %s13_s12  }
   0x2   : > { %p138_p1 = scmp.lt.s32.totalorder %s431_s12, 3 }
   0x4   : > { %p139_p2 = pnand %p408_p0, %p138_p1 }
   0x5   : > { %s409_s14 = sshll.u32 (!%p139_p2), %s404_s13, 5 }
   0x6   : > { %142 = sbr.rel (%p139_p2) target bundleno = 44 (0x2c), region = 32  ;;  %p163_p3 = scmp.lt.s32.totalorder (!%p139_p2), %s409_s14, 63 }
   0xb   : > { %s617_s14 = smov (!%p163_p3, %s409_s14), 63  ;;  %v464_v0 = vld [vmem:[%s613_s1] ss:$0 sm:$0xff] }
   0xc   : > { %s410_s15 = sshll.u32 %s617_s14, 3  ;;  %v474_v1 = vld [vmem:[%s614_s2] ss:$0 sm:$0xff] }
   0xd   : > { %s469_s20 = scalar_lea.vmem %s612_s0, %s410_s15  ;;  %s497_s25 = scalar_lea.vmem %s615_s3, %s410_s15 }
   0xe   : > { %v174_v2 = vld [vmem:[%s469_s20] sm:$0xff]  ;;  %v175_v3 = vld [vmem:[%s469_s20 + $0x8] sm:$0xff]  ;;  %v176_v4 = vld [vmem:[%s469_s20 + $0x10] sm:$0xff] }
   0xf   : > { %v213_v5 = vmul.f32 %v464_v0, %v174_v2  ;;  %v214_v6 = vmul.f32 %v464_v0, %v175_v3  ;;  %v215_v7 = vmul.f32 %v464_v0, %v176_v4  ;;  %v177_v8 = vld [vmem:[%s469_s20 + $0x18] sm:$0xff]  ;;  %v178_v9 = vld [vmem:[%s469_s20 + $0x20] sm:$0xff]  ;;  %v179_v10 = vld [vmem:[%s469_s20 + $0x28] sm:$0xff] }
  0x10   : > { %v216_v11 = vmul.f32 %v464_v0, %v177_v8  ;;  %v217_v12 = vmul.f32 %v464_v0, %v178_v9  ;;  %v218_v13 = vmul.f32 %v464_v0, %v179_v10  ;;  %v180_v14 = vld [vmem:[%s469_s20 + $0x30] sm:$0xff]  ;;  %v181_v15 = vld [vmem:[%s469_s20 + $0x38] sm:$0xff]  ;;  %v182_v24 = vld [vmem:[%s469_s20 + $0x40] sm:$0xff] }
  0x11   : > { %v252_v16 = vadd.f32 %v474_v1, %v213_v5  ;;  %v253_v17 = vadd.f32 %v474_v1, %v214_v6  ;;  %v254_v18 = vadd.f32 %v474_v1, %v215_v7  ;;  %v219_v19 = vmul.f32 %v464_v0, %v180_v14  ;;  %v183_v25 = vld [vmem:[%s469_s20 + $0x48] sm:$0xff]  ;;  %v184_v26 = vld [vmem:[%s469_s20 + $0x50] sm:$0xff]  ;;  %v185_v31 = vld [vmem:[%s469_s20 + $0x58] sm:$0xff] }
  0x12   : > { %v255_v20 = vadd.f32 %v474_v1, %v216_v11  ;;  %v256_v21 = vadd.f32 %v474_v1, %v217_v12  ;;  %v257_v22 = vadd.f32 %v474_v1, %v218_v13  ;;  %v220_v23 = vmul.f32 %v464_v0, %v181_v15  ;;  %v186_v32 = vld [vmem:[%s469_s20 + $0x60] sm:$0xff]  ;;  %v187_v33 = vld [vmem:[%s469_s20 + $0x68] sm:$0xff]  ;;  %v188_v38 = vld [vmem:[%s469_s20 + $0x70] sm:$0xff] }
  0x13   : > { %v284_v27 = vmax.f32 %v252_v16, 0.0  ;;  %v285_v28 = vmax.f32 %v253_v17, 0.0  ;;  %v286_v29 = vmax.f32 %v254_v18, 0.0  ;;  %v258_v30 = vadd.f32 %v474_v1, %v219_v19  ;;  %v189_v43 = vld [vmem:[%s469_s20 + $0x78] sm:$0xff]  ;;  %v190_v56 = vld [vmem:[%s469_s20 + $0x80] sm:$0xff]  ;;  %v191_v57 = vld [vmem:[%s469_s20 + $0x88] sm:$0xff] }
  0x14   : > { %v287_v34 = vmax.f32 %v255_v20, 0.0  ;;  %v288_v35 = vmax.f32 %v256_v21, 0.0  ;;  %v289_v36 = vmax.f32 %v257_v22, 0.0  ;;  %v259_v37 = vadd.f32 %v474_v1, %v220_v23  ;;  %v192_v58 = vld [vmem:[%s469_s20 + $0x90] sm:$0xff]  ;;  %v193_v63 = vld [vmem:[%s469_s20 + $0x98] sm:$0xff]  ;;  %v194_v2 = vld [vmem:[%s469_s20 + $0xa0] sm:$0xff] }
  0x15   : > { %316 = vst [vmem:[%s497_s25] sm:$0xff] %v284_v27  ;;  %317 = vst [vmem:[%s497_s25 + $0x8] sm:$0xff] %v285_v28  ;;  %v290_v39 = vmax.f32 %v258_v30, 0.0  ;;  %v221_v40 = vmul.f32 %v464_v0, %v182_v24  ;;  %v222_v41 = vmul.f32 %v464_v0, %v183_v25  ;;  %v223_v42 = vmul.f32 %v464_v0, %v184_v26  ;;  %v195_v3 = vld [vmem:[%s469_s20 + $0xa8] sm:$0xff]  ;;  %v196_v8 = vld [vmem:[%s469_s20 + $0xb0] sm:$0xff] }
  0x16   : > { %318 = vst [vmem:[%s497_s25 + $0x10] sm:$0xff] %v286_v29  ;;  %319 = vst [vmem:[%s497_s25 + $0x18] sm:$0xff] %v287_v34  ;;  %v291_v44 = vmax.f32 %v259_v37, 0.0  ;;  %v224_v45 = vmul.f32 %v464_v0, %v185_v31  ;;  %v225_v46 = vmul.f32 %v464_v0, %v186_v32  ;;  %v226_v47 = vmul.f32 %v464_v0, %v187_v33  ;;  %v197_v13 = vld [vmem:[%s469_s20 + $0xb8] sm:$0xff]  ;;  %v198_v26 = vld [vmem:[%s469_s20 + $0xc0] sm:$0xff] }
  0x17   : > { %320 = vst [vmem:[%s497_s25 + $0x20] sm:$0xff] %v288_v35  ;;  %321 = vst [vmem:[%s497_s25 + $0x28] sm:$0xff] %v289_v36  ;;  %v260_v48 = vadd.f32 %v474_v1, %v221_v40  ;;  %v261_v49 = vadd.f32 %v474_v1, %v222_v41  ;;  %v262_v50 = vadd.f32 %v474_v1, %v223_v42  ;;  %v199_v27 = vld [vmem:[%s469_s20 + $0xc8] sm:$0xff]  ;;  %v200_v28 = vld [vmem:[%s469_s20 + $0xd0] sm:$0xff] }
  0x18   : > { %322 = vst [vmem:[%s497_s25 + $0x30] sm:$0xff] %v290_v39  ;;  %v227_v51 = vmul.f32 %v464_v0, %v188_v38  ;;  %323 = vst [vmem:[%s497_s25 + $0x38] sm:$0xff] %v291_v44  ;;  %v263_v52 = vadd.f32 %v474_v1, %v224_v45  ;;  %v264_v53 = vadd.f32 %v474_v1, %v225_v46  ;;  %v201_v33 = vld [vmem:[%s469_s20 + $0xd8] sm:$0xff]  ;;  %v202_v34 = vld [vmem:[%s469_s20 + $0xe0] sm:$0xff] }
  0x19   : > { %v265_v54 = vadd.f32 %v474_v1, %v226_v47  ;;  %v228_v55 = vmul.f32 %v464_v0, %v189_v43  ;;  %v292_v59 = vmax.f32 %v260_v48, 0.0  ;;  %v293_v60 = vmax.f32 %v261_v49, 0.0  ;;  %v203_v35 = vld [vmem:[%s469_s20 + $0xe8] sm:$0xff]  ;;  %v204_v40 = vld [vmem:[%s469_s20 + $0xf0] sm:$0xff]  ;;  %v205_v45 = vld [vmem:[%s469_s20 + $0xf8] sm:$0xff] }
  0x1a   : > { %v294_v61 = vmax.f32 %v262_v50, 0.0  ;;  %v266_v62 = vadd.f32 %v474_v1, %v227_v51  ;;  %v295_v4 = vmax.f32 %v263_v52, 0.0  ;;  %v296_v5 = vmax.f32 %v264_v53, 0.0 }
  0x1b   : > { %v297_v6 = vmax.f32 %v265_v54, 0.0  ;;  %v267_v7 = vadd.f32 %v474_v1, %v228_v55  ;;  %324 = vst [vmem:[%s497_s25 + $0x40] sm:$0xff] %v292_v59  ;;  %325 = vst [vmem:[%s497_s25 + $0x48] sm:$0xff] %v293_v60  ;;  %v229_v10 = vmul.f32 %v464_v0, %v190_v56  ;;  %v230_v11 = vmul.f32 %v464_v0, %v191_v57 }
  0x1c   : > { %326 = vst [vmem:[%s497_s25 + $0x50] sm:$0xff] %v294_v61  ;;  %v298_v9 = vmax.f32 %v266_v62, 0.0  ;;  %v231_v12 = vmul.f32 %v464_v0, %v192_v58  ;;  %327 = vst [vmem:[%s497_s25 + $0x58] sm:$0xff] %v295_v4  ;;  %v232_v15 = vmul.f32 %v464_v0, %v193_v63  ;;  %v233_v16 = vmul.f32 %v464_v0, %v194_v2 }
  0x1d   : > { %328 = vst [vmem:[%s497_s25 + $0x60] sm:$0xff] %v296_v5  ;;  %329 = vst [vmem:[%s497_s25 + $0x68] sm:$0xff] %v297_v6  ;;  %v299_v14 = vmax.f32 %v267_v7, 0.0  ;;  %v234_v17 = vmul.f32 %v464_v0, %v195_v3  ;;  %v268_v18 = vadd.f32 %v474_v1, %v229_v10  ;;  %v269_v19 = vadd.f32 %v474_v1, %v230_v11 }
  0x1e   : > { %330 = vst [vmem:[%s497_s25 + $0x70] sm:$0xff] %v298_v9  ;;  %v270_v20 = vadd.f32 %v474_v1, %v231_v12  ;;  %v235_v21 = vmul.f32 %v464_v0, %v196_v8  ;;  %v271_v22 = vadd.f32 %v474_v1, %v232_v15  ;;  %v272_v23 = vadd.f32 %v474_v1, %v233_v16 }
  0x1f   : > { %331 = vst [vmem:[%s497_s25 + $0x78] sm:$0xff] %v299_v14  ;;  %v273_v24 = vadd.f32 %v474_v1, %v234_v17  ;;  %v236_v25 = vmul.f32 %v464_v0, %v197_v13  ;;  %v300_v29 = vmax.f32 %v268_v18, 0.0  ;;  %v301_v30 = vmax.f32 %v269_v19, 0.0 }
  0x20   : > { %v302_v31 = vmax.f32 %v270_v20, 0.0  ;;  %v274_v32 = vadd.f32 %v474_v1, %v235_v21  ;;  %v303_v36 = vmax.f32 %v271_v22, 0.0  ;;  %v304_v37 = vmax.f32 %v272_v23, 0.0 }
  0x21   : > { %v305_v38 = vmax.f32 %v273_v24, 0.0  ;;  %v275_v39 = vadd.f32 %v474_v1, %v236_v25  ;;  %332 = vst [vmem:[%s497_s25 + $0x80] sm:$0xff] %v300_v29  ;;  %333 = vst [vmem:[%s497_s25 + $0x88] sm:$0xff] %v301_v30  ;;  %v237_v42 = vmul.f32 %v464_v0, %v198_v26  ;;  %v238_v43 = vmul.f32 %v464_v0, %v199_v27 }
  0x22   : > { %334 = vst [vmem:[%s497_s25 + $0x90] sm:$0xff] %v302_v31  ;;  %v306_v41 = vmax.f32 %v274_v32, 0.0  ;;  %v239_v44 = vmul.f32 %v464_v0, %v200_v28  ;;  %335 = vst [vmem:[%s497_s25 + $0x98] sm:$0xff] %v303_v36  ;;  %v240_v47 = vmul.f32 %v464_v0, %v201_v33  ;;  %v241_v48 = vmul.f32 %v464_v0, %v202_v34 }
  0x23   : > { %336 = vst [vmem:[%s497_s25 + $0xa0] sm:$0xff] %v304_v37  ;;  %337 = vst [vmem:[%s497_s25 + $0xa8] sm:$0xff] %v305_v38  ;;  %v307_v46 = vmax.f32 %v275_v39, 0.0  ;;  %v242_v49 = vmul.f32 %v464_v0, %v203_v35  ;;  %v276_v50 = vadd.f32 %v474_v1, %v237_v42  ;;  %v277_v51 = vadd.f32 %v474_v1, %v238_v43 }
  0x24   : > { %338 = vst [vmem:[%s497_s25 + $0xb0] sm:$0xff] %v306_v41  ;;  %v278_v52 = vadd.f32 %v474_v1, %v239_v44  ;;  %v243_v53 = vmul.f32 %v464_v0, %v204_v40  ;;  %v279_v54 = vadd.f32 %v474_v1, %v240_v47  ;;  %v280_v55 = vadd.f32 %v474_v1, %v241_v48 }
  0x25   : > { %339 = vst [vmem:[%s497_s25 + $0xb8] sm:$0xff] %v307_v46  ;;  %v281_v56 = vadd.f32 %v474_v1, %v242_v49  ;;  %v244_v57 = vmul.f32 %v464_v0, %v205_v45  ;;  %v308_v58 = vmax.f32 %v276_v50, 0.0  ;;  %v309_v59 = vmax.f32 %v277_v51, 0.0 }
  0x26   : > { %v310_v60 = vmax.f32 %v278_v52, 0.0  ;;  %v282_v61 = vadd.f32 %v474_v1, %v243_v53  ;;  %v311_v62 = vmax.f32 %v279_v54, 0.0  ;;  %v312_v63 = vmax.f32 %v280_v55, 0.0 }
  0x27   : > { %v313_v2 = vmax.f32 %v281_v56, 0.0  ;;  %v283_v3 = vadd.f32 %v474_v1, %v244_v57  ;;  %340 = vst [vmem:[%s497_s25 + $0xc0] sm:$0xff] %v308_v58  ;;  %341 = vst [vmem:[%s497_s25 + $0xc8] sm:$0xff] %v309_v59 }
  0x28   : > { %342 = vst [vmem:[%s497_s25 + $0xd0] sm:$0xff] %v310_v60  ;;  %v314_v4 = vmax.f32 %v282_v61, 0.0  ;;  %343 = vst [vmem:[%s497_s25 + $0xd8] sm:$0xff] %v311_v62 }
  0x29   : > { %344 = vst [vmem:[%s497_s25 + $0xe0] sm:$0xff] %v312_v63  ;;  %345 = vst [vmem:[%s497_s25 + $0xe8] sm:$0xff] %v313_v2  ;;  %v315_v0 = vmax.f32 %v283_v3, 0.0 }
  0x2a   : > { %346 = vst [vmem:[%s497_s25 + $0xf0] sm:$0xff] %v314_v4 }
  0x2b   : > { %347 = vst [vmem:[%s497_s25 + $0xf8] sm:$0xff] %v315_v0 }
  0x2c PF: > { %s13_s12 = sadd.s32 1, %s431_s12  }
  0x2d   : > { %p10_p4 = scmp.ge.s32.totalorder %s13_s12, 4  }
  0x2f   :  { %12 = sbr.rel (!%p10_p4) target bundleno = 1 (0x1), region = 62 }

// kernel: double_conv.4
= control target key start
LH: loop header
LB: loop body
LE: loop exit
PB: predicated region body
PF: predicated region fallthrough
CT: control target
= control target key end

     0   :  { %s3331_s12 = smov 0   ;;  %s3333_s13 = smov 0   ;;  %s4365_s0 = inlined_call_operand.vmem [shape: f32[2,18,18,128], index: 0, kind: input, shape index: {}]   ;;  %s4366_s1 = inlined_call_operand.vmem [shape: f32[3,3,128,128], index: 1, kind: input, shape index: {}]   ;;  %s4367_s2 = inlined_call_operand.vmem [shape: f32[2,16,16,128], index: 2, kind: output, shape index: {0}]   ;;  %s4368_s3 = inlined_call_operand.vmem [shape: f32[2,2,2,128], index: 3, kind: output, shape index: {1}]  }
   0x1   :  { %s3335_s14 = smov 0   ;;  %s3337_s15 = smov 0  }
   0x2   :  { %s3339_s16 = smov 0  }
   0x3 LB: > { %s23_s17 = sadd.s32 1, %s3301_s14  ;;  %s26_s18 = sadd.s32 1, %s3305_s15  ;;  %s3309_s16 = sphi %s3339_s16, %s14_s16   ;;  %s3305_s15 = sphi %s3337_s15, %s4408_s15   ;;  %s3301_s14 = sphi %s3335_s14, %s4407_s14   ;;  %s3297_s13 = sphi %s3333_s13, %s4406_s13   ;;  %s3293_s12 = sphi %s3331_s12, %s4405_s12  }
   0x4   : > { %p24_p0 = scmp.ge.s32.totalorder %s23_s17, 2  ;;  %p2166_p1 = scmp.ge.s32.totalorder %s3309_s16, 1 }
   0x5   : > { %p156_p2 = scmp.lt.s32.totalorder %s3309_s16, 5 }
   0x6   : > { %s4410_s17 = smov (%p24_p0, %s23_s17), 0  ;;  %s4412_s18 = smov (!%p24_p0, %s26_s18), %s3305_s15 }
   0x7   : > { %p157_p3 = pnand %p2166_p1, %p156_p2  ;;  %p28_p4 = scmp.ge.s32.totalorder %s4412_s18, 2 }
   0x9   : > { %s4414_s18 = smov (%p28_p4, %s4412_s18), 0  ;;  %160 = sbr.rel (%p157_p3) target bundleno = 484 (0x1e4), region = 28 }
   0xe   : > { %v2191_v0 = vld [vmem:[%s4366_s1 + $0xf8] sm:$0xff]  ;;  %v2190_v2 = vld [vmem:[%s4366_s1 + $0xf0] sm:$0xff]  ;;  %v2189_v4 = vld [vmem:[%s4366_s1 + $0xe8] sm:$0xff]  ;;  %p193_p5 = scmp.lt.s32.totalorder %s3297_s13, 1  ;;  %s2175_s5 = smul.u32 192, %s3293_s12 }
   0xf   : > { %v251_v1 = vld [vmem:[%s4366_s1 + $0x78] sm:$0xff]  ;;  %2694 = vmatprep.subr.mxu0 %v2191_v0  ;;  %v250_v3 = vld [vmem:[%s4366_s1 + $0x70] sm:$0xff]  ;;  %v249_v5 = vld [vmem:[%s4366_s1 + $0x68] sm:$0xff]  ;;  %p211_p7 = scmp.lt.s32.totalorder %s3293_s12, 1 }
  0x10   : > { %2750 = vmatprep.subr.mxu1 %v251_v1  ;;  %2695 = vmatpush3.msra.mxu0 %v2191_v0  ;;  %v2188_v6 = vld [vmem:[%s4366_s1 + $0xe0] sm:$0xff]  ;;  %v2187_v8 = vld [vmem:[%s4366_s1 + $0xd8] sm:$0xff]  ;;  %v2186_v10 = vld [vmem:[%s4366_s1 + $0xd0] sm:$0xff]  ;;  %s4416_s13 = smov (!%p193_p5, %s3297_s13), 1 }
  0x11   : > { %2751 = vmatpush3.msra.mxu1 %v251_v1  ;;  %2696 = vmatprep.subr.mxu0 %v2190_v2  ;;  %v248_v7 = vld [vmem:[%s4366_s1 + $0x60] sm:$0xff]  ;;  %v247_v9 = vld [vmem:[%s4366_s1 + $0x58] sm:$0xff]  ;;  %v246_v11 = vld [vmem:[%s4366_s1 + $0x50] sm:$0xff]  ;;  %s3230_s23 = smul.u32 432, %s4416_s13  ;;  %s2170_s26 = sshll.u32 %s4416_s13, 5 }
  0x12   : > { %2752 = vmatprep.subr.mxu1 %v250_v3  ;;  %2697 = vmatpush3.msra.mxu0 %v2190_v2  ;;  %v2185_v12 = vld [vmem:[%s4366_s1 + $0xc8] sm:$0xff]  ;;  %v2184_v14 = vld [vmem:[%s4366_s1 + $0xc0] sm:$0xff]  ;;  %v2183_v16 = vld [vmem:[%s4366_s1 + $0xb8] sm:$0xff] }
  0x13   : > { %2753 = vmatpush3.msra.mxu1 %v250_v3  ;;  %2698 = vmatprep.subr.mxu0 %v2189_v4  ;;  %v245_v13 = vld [vmem:[%s4366_s1 + $0x48] sm:$0xff]  ;;  %v244_v15 = vld [vmem:[%s4366_s1 + $0x40] sm:$0xff]  ;;  %v243_v17 = vld [vmem:[%s4366_s1 + $0x38] sm:$0xff]  ;;  %s197_s8 = scalar_lea.vmem %s4365_s0, %s3230_s23 }
  0x14   : > { %2754 = vmatprep.subr.mxu1 %v249_v5  ;;  %2699 = vmatpush3.msra.mxu0 %v2189_v4  ;;  %v2182_v18 = vld [vmem:[%s4366_s1 + $0xb0] sm:$0xff]  ;;  %v2181_v20 = vld [vmem:[%s4366_s1 + $0xa8] sm:$0xff]  ;;  %v2180_v22 = vld [vmem:[%s4366_s1 + $0xa0] sm:$0xff]  ;;  %s3464_s24 = scalar_lea.vmem %s197_s8, %s2175_s5  ;;  %s2172_s5 = sshll.u32 %s4416_s13, 1 }
  0x15   : > { %2755 = vmatpush3.msra.mxu1 %v249_v5  ;;  %2700 = vmatprep.subr.mxu0 %v2188_v6  ;;  %v242_v19 = vld [vmem:[%s4366_s1 + $0x30] sm:$0xff]  ;;  %v241_v21 = vld [vmem:[%s4366_s1 + $0x28] sm:$0xff]  ;;  %v240_v23 = vld [vmem:[%s4366_s1 + $0x20] sm:$0xff] }
  0x16   : > { %2756 = vmatprep.subr.mxu1 %v248_v7  ;;  %2701 = vmatpush3.msra.mxu0 %v2188_v6  ;;  %v2179_v24 = vld [vmem:[%s4366_s1 + $0x98] sm:$0xff]  ;;  %v2178_v26 = vld [vmem:[%s4366_s1 + $0x90] sm:$0xff]  ;;  %v2177_v28 = vld [vmem:[%s4366_s1 + $0x88] sm:$0xff] }
  0x17   : > { %2757 = vmatpush3.msra.mxu1 %v248_v7  ;;  %2702 = vmatprep.subr.mxu0 %v2187_v8  ;;  %v239_v25 = vld [vmem:[%s4366_s1 + $0x18] sm:$0xff]  ;;  %v238_v27 = vld [vmem:[%s4366_s1 + $0x10] sm:$0xff]  ;;  %v237_v29 = vld [vmem:[%s4366_s1 + $0x8] sm:$0xff] }
  0x18   : > { %2758 = vmatprep.subr.mxu1 %v247_v9  ;;  %2703 = vmatpush3.msra.mxu0 %v2187_v8  ;;  %v2176_v30 = vld [vmem:[%s4366_s1 + $0x80] sm:$0xff]  ;;  %v253_v34 = vld [vmem:[%s3464_s24 + $0x9] sm:$0xff]  ;;  %v2207_v36 = vld [vmem:[%s4366_s1 + $0x178] sm:$0xff] }
  0x19   : > { %2759 = vmatpush3.msra.mxu1 %v247_v9  ;;  %2704 = vmatprep.subr.mxu0 %v2186_v10  ;;  %v236_v31 = vld [vmem:[%s4366_s1] sm:$0xff]  ;;  %v221_v35 = vld [vmem:[%s3464_s24 + $0x8] sm:$0xff]  ;;  %v2241_v37 = vld [vmem:[%s4366_s1 + $0x1f8] sm:$0xff] }
  0x1a   : > { %2760 = vmatprep.subr.mxu1 %v246_v11  ;;  %2705 = vmatpush3.msra.mxu0 %v2186_v10  ;;  %v252_v32 = vld [vmem:[%s3464_s24 + $0x1] sm:$0xff]  ;;  %v2206_v38 = vld [vmem:[%s4366_s1 + $0x170] sm:$0xff]  ;;  %v3489_v40 = vld [vmem:[%s3464_s24 + $0x19] sm:$0xff] }
  0x1b   : > { %2761 = vmatpush3.msra.mxu1 %v246_v11  ;;  %2706 = vmatprep.subr.mxu0 %v2185_v12  ;;  %v220_v33 = vld [vmem:[%s3464_s24] sm:$0xff]  ;;  %v2240_v39 = vld [vmem:[%s4366_s1 + $0x1f0] sm:$0xff]  ;;  %v3492_v41 = vld [vmem:[%s3464_s24 + $0x18] sm:$0xff] }
  0x1c   : > { %2762 = vmatprep.subr.mxu1 %v245_v13  ;;  %2707 = vmatpush3.msra.mxu0 %v2185_v12  ;;  %v3495_v42 = vld [vmem:[%s3464_s24 + $0x21] sm:$0xff]  ;;  %v3517_v48 = vld [vmem:[%s3464_s24 + $0x31] sm:$0xff]  ;;  %v3523_v50 = vld [vmem:[%s3464_s24 + $0x39] sm:$0xff] }
  0x1d   : > { %2763 = vmatpush3.msra.mxu1 %v245_v13  ;;  %2708 = vmatprep.subr.mxu0 %v2184_v14  ;;  %v3498_v43 = vld [vmem:[%s3464_s24 + $0x20] sm:$0xff]  ;;  %v2205_v44 = vld [vmem:[%s4366_s1 + $0x168] sm:$0xff]  ;;  %v3520_v49 = vld [vmem:[%s3464_s24 + $0x30] sm:$0xff] }
  0x1e   : > { %2764 = vmatprep.subr.mxu1 %v244_v15  ;;  %2709 = vmatpush3.msra.mxu0 %v2184_v14  ;;  %v2239_v45 = vld [vmem:[%s4366_s1 + $0x1e8] sm:$0xff]  ;;  %v2204_v46 = vld [vmem:[%s4366_s1 + $0x160] sm:$0xff]  ;;  %v3526_v51 = vld [vmem:[%s3464_s24 + $0x38] sm:$0xff] }
  0x1f   : > { %2765 = vmatpush3.msra.mxu1 %v244_v15  ;;  %2710 = vmatprep.subr.mxu0 %v2183_v16  ;;  %v2238_v47 = vld [vmem:[%s4366_s1 + $0x1e0] sm:$0xff]  ;;  %v2203_v52 = vld [vmem:[%s4366_s1 + $0x158] sm:$0xff]  ;;  %v2202_v54 = vld [vmem:[%s4366_s1 + $0x150] sm:$0xff] }
  0x20   : > { %2766 = vmatprep.subr.mxu1 %v243_v17  ;;  %2711 = vmatpush3.msra.mxu0 %v2183_v16  ;;  %v2237_v53 = vld [vmem:[%s4366_s1 + $0x1d8] sm:$0xff]  ;;  %v2236_v55 = vld [vmem:[%s4366_s1 + $0x1d0] sm:$0xff]  ;;  %v3548_v57 = vld [vmem:[%s3464_s24 + $0x48] sm:$0xff] }
  0x21   : > { %2767 = vmatpush3.msra.mxu1 %v243_v17  ;;  %2712 = vmatprep.subr.mxu0 %v2182_v18  ;;  %v3545_v56 = vld [vmem:[%s3464_s24 + $0x49] sm:$0xff]  ;;  %v3551_v58 = vld [vmem:[%s3464_s24 + $0x51] sm:$0xff]  ;;  %v2200_v62 = vld [vmem:[%s4366_s1 + $0x140] sm:$0xff] }
  0x22   : > { %2768 = vmatprep.subr.mxu1 %v242_v19  ;;  %2713 = vmatpush3.msra.mxu0 %v2182_v18  ;;  %v3554_v59 = vld [vmem:[%s3464_s24 + $0x50] sm:$0xff]  ;;  %v2201_v60 = vld [vmem:[%s4366_s1 + $0x148] sm:$0xff]  ;;  %v2234_v63 = vld [vmem:[%s4366_s1 + $0x1c0] sm:$0xff] }
  0x23   : > { %2769 = vmatpush3.msra.mxu1 %v242_v19  ;;  %2714 = vmatprep.subr.mxu0 %v2181_v20  ;;  %v2235_v61 = vld [vmem:[%s4366_s1 + $0x1c8] sm:$0xff]  ;;  %v3576_v1 = vld [vmem:[%s3464_s24 + $0x60] sm:$0xff]  ;;  %v2199_v4 = vld [vmem:[%s4366_s1 + $0x138] sm:$0xff] }
  0x24   : > { %2770 = vmatprep.subr.mxu1 %v241_v21  ;;  %2715 = vmatpush3.msra.mxu0 %v2181_v20  ;;  %v3573_v0 = vld [vmem:[%s3464_s24 + $0x61] sm:$0xff]  ;;  %v3579_v2 = vld [vmem:[%s3464_s24 + $0x69] sm:$0xff]  ;;  %v2233_v5 = vld [vmem:[%s4366_s1 + $0x1b8] sm:$0xff] }
  0x25   : > { %2771 = vmatpush3.msra.mxu1 %v241_v21  ;;  %2716 = vmatprep.subr.mxu0 %v2180_v22  ;;  %v3582_v3 = vld [vmem:[%s3464_s24 + $0x68] sm:$0xff]  ;;  %v2198_v6 = vld [vmem:[%s4366_s1 + $0x130] sm:$0xff]  ;;  %v3601_v8 = vld [vmem:[%s3464_s24 + $0x79] sm:$0xff] }
  0x26   : > { %2772 = vmatprep.subr.mxu1 %v240_v23  ;;  %2717 = vmatpush3.msra.mxu0 %v2180_v22  ;;  %v2232_v7 = vld [vmem:[%s4366_s1 + $0x1b0] sm:$0xff]  ;;  %v3604_v9 = vld [vmem:[%s3464_s24 + $0x78] sm:$0xff]  ;;  %v3607_v10 = vld [vmem:[%s3464_s24 + $0x81] sm:$0xff] }
  0x27   : > { %2773 = vmatpush3.msra.mxu1 %v240_v23  ;;  %2718 = vmatprep.subr.mxu0 %v2179_v24  ;;  %v3610_v11 = vld [vmem:[%s3464_s24 + $0x80] sm:$0xff]  ;;  %v2197_v12 = vld [vmem:[%s4366_s1 + $0x128] sm:$0xff]  ;;  %v3629_v16 = vld [vmem:[%s3464_s24 + $0x91] sm:$0xff] }
  0x28   : > { %2774 = vmatprep.subr.mxu1 %v239_v25  ;;  %2719 = vmatpush3.msra.mxu0 %v2179_v24  ;;  %v2231_v13 = vld [vmem:[%s4366_s1 + $0x1a8] sm:$0xff]  ;;  %v2196_v14 = vld [vmem:[%s4366_s1 + $0x120] sm:$0xff]  ;;  %v3632_v17 = vld [vmem:[%s3464_s24 + $0x90] sm:$0xff] }
  0x29   : > { %2775 = vmatpush3.msra.mxu1 %v239_v25  ;;  %2720 = vmatprep.subr.mxu0 %v2178_v26  ;;  %v2230_v15 = vld [vmem:[%s4366_s1 + $0x1a0] sm:$0xff]  ;;  %v3638_v19 = vld [vmem:[%s3464_s24 + $0x98] sm:$0xff]  ;;  %v2194_v22 = vld [vmem:[%s4366_s1 + $0x110] sm:$0xff] }
  0x2a   : > { %2776 = vmatprep.subr.mxu1 %v238_v27  ;;  %2721 = vmatpush3.msra.mxu0 %v2178_v26  ;;  %v3635_v18 = vld [vmem:[%s3464_s24 + $0x99] sm:$0xff]  ;;  %v2228_v23 = vld [vmem:[%s4366_s1 + $0x190] sm:$0xff]  ;;  %v3660_v25 = vld [vmem:[%s3464_s24 + $0xa8] sm:$0xff] }
  0x2b   : > { %2777 = vmatpush3.msra.mxu1 %v238_v27  ;;  %2722 = vmatprep.subr.mxu0 %v2177_v28  ;;  %v2195_v20 = vld [vmem:[%s4366_s1 + $0x118] sm:$0xff]  ;;  %v3657_v24 = vld [vmem:[%s3464_s24 + $0xa9] sm:$0xff] }
  0x2c   : > { %2778 = vmatprep.subr.mxu1 %v237_v29  ;;  %2723 = vmatpush3.msra.mxu0 %v2177_v28  ;;  %v2229_v21 = vld [vmem:[%s4366_s1 + $0x198] sm:$0xff]  ;;  %v3666_v27 = vld [vmem:[%s3464_s24 + $0xb0] sm:$0xff]  ;;  %v2193_v28 = vld [vmem:[%s4366_s1 + $0x108] sm:$0xff] }
  0x2d   : > { %2779 = vmatpush3.msra.mxu1 %v237_v29  ;;  %2724 = vmatprep.subr.mxu0 %v2176_v30  ;;  %v3663_v26 = vld [vmem:[%s3464_s24 + $0xb1] sm:$0xff]  ;;  %v2227_v29 = vld [vmem:[%s4366_s1 + $0x188] sm:$0xff] }
  0x2e   : > { %2780 = vmatprep.subr.mxu1 %v236_v31  ;;  %2725 = vmatpush3.msra.mxu0 %v2176_v30  ;;  %v2192_v30 = vld [vmem:[%s4366_s1 + $0x100] sm:$0xff] }
  0x2f   : > { %2726 = vmatprep.mubr.f32.mxu0 %v252_v32  ;;  %2781 = vmatpush3.msra.mxu1 %v236_v31  ;;  %v2226_v31 = vld [vmem:[%s4366_s1 + $0x180] sm:$0xff] }
  0x30   : > { %2782 = vmatprep.mubr.f32.mxu1 %v220_v33  ;;  %2727 = vmatmul.mubr.f32.vlgmr.msra.gmra.mxu0 %v253_v34  ;;  %v575_v32 = vld [vmem:[%s3464_s24 + $0x2] sm:$0xff]  ;;  %v576_v33 = vld [vmem:[%s3464_s24 + $0xa] sm:$0xff]  ;;  %v2273_v34 = vld [vmem:[%s4366_s1 + $0x278] sm:$0xff] }
  0x31   : > { %2783 = vmatmul.mubr.f32.vlgmr.msra.gmra.mxu1 %v221_v35  ;;  %2806 = vmatprep.subr.mxu0 %v2207_v36  ;;  %v2305_v35 = vld [vmem:[%s4366_s1 + $0x2f8] sm:$0xff] }
  0x32   : > { %2862 = vmatprep.subr.mxu1 %v2241_v37  ;;  %2807 = vmatpush3.msra.mxu0 %v2207_v36  ;;  %v2272_v36 = vld [vmem:[%s4366_s1 + $0x270] sm:$0xff] }
  0x33   : > { %2863 = vmatpush3.msra.mxu1 %v2241_v37  ;;  %2808 = vmatprep.subr.mxu0 %v2206_v38  ;;  %v2304_v37 = vld [vmem:[%s4366_s1 + $0x2f0] sm:$0xff] }
  0x34   : > { %2864 = vmatprep.subr.mxu1 %v2240_v39  ;;  %2729 = vmatprep.mubr.f32.mxu0 %v3489_v40 }
  0x35   : > { %2785 = vmatprep.mubr.f32.mxu1 %v3492_v41  ;;  %2809 = vmatpush3.msra.mxu0 %v2206_v38  ;;  %v3701_v38 = vld [vmem:[%s3464_s24 + $0x1a] sm:$0xff] }
  0x36   : > { %2865 = vmatpush3.msra.mxu1 %v2240_v39  ;;  %2730 = vmatmul.mubr.f32.gmra.mxu0 %v3495_v42  ;;  %v3704_v39 = vld [vmem:[%s3464_s24 + $0x22] sm:$0xff] }
  0x37   : > { %2786 = vmatmul.mubr.f32.gmra.mxu1 %v3498_v43  ;;  %2810 = vmatprep.subr.mxu0 %v2205_v44 }
  0x38   : > { %2866 = vmatprep.subr.mxu1 %v2239_v45  ;;  %2811 = vmatpush3.msra.mxu0 %v2205_v44  ;;  %v2270_v44 = vld [vmem:[%s4366_s1 + $0x260] sm:$0xff] }
  0x39   : > { %2867 = vmatpush3.msra.mxu1 %v2239_v45  ;;  %2812 = vmatprep.subr.mxu0 %v2204_v46  ;;  %v2302_v45 = vld [vmem:[%s4366_s1 + $0x2e0] sm:$0xff] }
  0x3a   : > { %2868 = vmatprep.subr.mxu1 %v2238_v47  ;;  %2732 = vmatprep.mubr.f32.mxu0 %v3517_v48 }
  0x3b   : > { %2788 = vmatprep.mubr.f32.mxu1 %v3520_v49  ;;  %2813 = vmatpush3.msra.mxu0 %v2204_v46  ;;  %v3723_v46 = vld [vmem:[%s3464_s24 + $0x32] sm:$0xff] }
  0x3c   : > { %2869 = vmatpush3.msra.mxu1 %v2238_v47  ;;  %2733 = vmatmul.mubr.f32.gmra.mxu0 %v3523_v50  ;;  %v3726_v47 = vld [vmem:[%s3464_s24 + $0x3a] sm:$0xff] }
  0x3d   : > { %2789 = vmatmul.mubr.f32.gmra.mxu1 %v3526_v51  ;;  %2814 = vmatprep.subr.mxu0 %v2203_v52 }
  0x3e   : > { %2870 = vmatprep.subr.mxu1 %v2237_v53  ;;  %2815 = vmatpush3.msra.mxu0 %v2203_v52  ;;  %v2269_v52 = vld [vmem:[%s4366_s1 + $0x258] sm:$0xff] }
  0x3f   : > { %2871 = vmatpush3.msra.mxu1 %v2237_v53  ;;  %2816 = vmatprep.subr.mxu0 %v2202_v54  ;;  %v2301_v53 = vld [vmem:[%s4366_s1 + $0x2d8] sm:$0xff] }
  0x40   : > { %2872 = vmatprep.subr.mxu1 %v2236_v55  ;;  %2735 = vmatprep.mubr.f32.mxu0 %v3545_v56 }
  0x41   : > { %2791 = vmatprep.mubr.f32.mxu1 %v3548_v57  ;;  %2817 = vmatpush3.msra.mxu0 %v2202_v54  ;;  %v2268_v54 = vld [vmem:[%s4366_s1 + $0x250] sm:$0xff] }
  0x42   : > { %2873 = vmatpush3.msra.mxu1 %v2236_v55  ;;  %2736 = vmatmul.mubr.f32.gmra.mxu0 %v3551_v58  ;;  %v2300_v55 = vld [vmem:[%s4366_s1 + $0x2d0] sm:$0xff] }
  0x43   : > { %2792 = vmatmul.mubr.f32.gmra.mxu1 %v3554_v59  ;;  %2818 = vmatprep.subr.mxu0 %v2201_v60 }
  0x44   : > { %2874 = vmatprep.subr.mxu1 %v2235_v61  ;;  %2819 = vmatpush3.msra.mxu0 %v2201_v60  ;;  %v3745_v60 = vld [vmem:[%s3464_s24 + $0x4a] sm:$0xff] }
  0x45   : > { %2875 = vmatpush3.msra.mxu1 %v2235_v61  ;;  %2820 = vmatprep.subr.mxu0 %v2200_v62  ;;  %v3748_v61 = vld [vmem:[%s3464_s24 + $0x52] sm:$0xff] }
  0x46   : > { %2876 = vmatprep.subr.mxu1 %v2234_v63  ;;  %2738 = vmatprep.mubr.f32.mxu0 %v3573_v0 }
  0x47   : > { %2794 = vmatprep.mubr.f32.mxu1 %v3576_v1  ;;  %2821 = vmatpush3.msra.mxu0 %v2200_v62  ;;  %v2267_v62 = vld [vmem:[%s4366_s1 + $0x248] sm:$0xff] }
  0x48   : > { %2877 = vmatpush3.msra.mxu1 %v2234_v63  ;;  %2739 = vmatmul.mubr.f32.gmra.mxu0 %v3579_v2  ;;  %v2299_v63 = vld [vmem:[%s4366_s1 + $0x2c8] sm:$0xff] }
  0x49   : > { %2795 = vmatmul.mubr.f32.gmra.mxu1 %v3582_v3  ;;  %2822 = vmatprep.subr.mxu0 %v2199_v4 }
  0x4a   : > { %2878 = vmatprep.subr.mxu1 %v2233_v5  ;;  %2823 = vmatpush3.msra.mxu0 %v2199_v4  ;;  %v2266_v4 = vld [vmem:[%s4366_s1 + $0x240] sm:$0xff] }
  0x4b   : > { %2879 = vmatpush3.msra.mxu1 %v2233_v5  ;;  %2824 = vmatprep.subr.mxu0 %v2198_v6  ;;  %v2298_v5 = vld [vmem:[%s4366_s1 + $0x2c0] sm:$0xff] }
  0x4c   : > { %2880 = vmatprep.subr.mxu1 %v2232_v7  ;;  %2741 = vmatprep.mubr.f32.mxu0 %v3601_v8 }
  0x4d   : > { %2797 = vmatprep.mubr.f32.mxu1 %v3604_v9  ;;  %2825 = vmatpush3.msra.mxu0 %v2198_v6  ;;  %v3767_v6 = vld [vmem:[%s3464_s24 + $0x62] sm:$0xff] }
  0x4e   : > { %2881 = vmatpush3.msra.mxu1 %v2232_v7  ;;  %2742 = vmatmul.mubr.f32.gmra.mxu0 %v3607_v10  ;;  %v3770_v7 = vld [vmem:[%s3464_s24 + $0x6a] sm:$0xff] }
  0x4f   : > { %2798 = vmatmul.mubr.f32.gmra.mxu1 %v3610_v11  ;;  %2826 = vmatprep.subr.mxu0 %v2197_v12 }
  0x50   : > { %2882 = vmatprep.subr.mxu1 %v2231_v13  ;;  %2827 = vmatpush3.msra.mxu0 %v2197_v12  ;;  %v2265_v12 = vld [vmem:[%s4366_s1 + $0x238] sm:$0xff] }
  0x51   : > { %2883 = vmatpush3.msra.mxu1 %v2231_v13  ;;  %2828 = vmatprep.subr.mxu0 %v2196_v14  ;;  %v2297_v13 = vld [vmem:[%s4366_s1 + $0x2b8] sm:$0xff] }
  0x52   : > { %2884 = vmatprep.subr.mxu1 %v2230_v15  ;;  %2744 = vmatprep.mubr.f32.mxu0 %v3629_v16 }
  0x53   : > { %2800 = vmatprep.mubr.f32.mxu1 %v3632_v17  ;;  %2829 = vmatpush3.msra.mxu0 %v2196_v14  ;;  %v2264_v14 = vld [vmem:[%s4366_s1 + $0x230] sm:$0xff] }
  0x54   : > { %2885 = vmatpush3.msra.mxu1 %v2230_v15  ;;  %2745 = vmatmul.mubr.f32.gmra.mxu0 %v3635_v18  ;;  %v2296_v15 = vld [vmem:[%s4366_s1 + $0x2b0] sm:$0xff] }
  0x55   : > { %2801 = vmatmul.mubr.f32.gmra.mxu1 %v3638_v19  ;;  %2830 = vmatprep.subr.mxu0 %v2195_v20 }
  0x56   : > { %2886 = vmatprep.subr.mxu1 %v2229_v21  ;;  %2831 = vmatpush3.msra.mxu0 %v2195_v20  ;;  %v3789_v20 = vld [vmem:[%s3464_s24 + $0x7a] sm:$0xff] }
  0x57   : > { %2887 = vmatpush3.msra.mxu1 %v2229_v21  ;;  %2832 = vmatprep.subr.mxu0 %v2194_v22  ;;  %v3792_v21 = vld [vmem:[%s3464_s24 + $0x82] sm:$0xff] }
  0x58   : > { %2888 = vmatprep.subr.mxu1 %v2228_v23  ;;  %2747 = vmatprep.mubr.f32.mxu0 %v3657_v24 }
  0x59   : > { %2803 = vmatprep.mubr.f32.mxu1 %v3660_v25  ;;  %2833 = vmatpush3.msra.mxu0 %v2194_v22  ;;  %v2263_v22 = vld [vmem:[%s4366_s1 + $0x228] sm:$0xff] }
  0x5a   : > { %2889 = vmatpush3.msra.mxu1 %v2228_v23  ;;  %2748 = vmatmul.mubr.f32.gmra.mxu0 %v3663_v26  ;;  %v2295_v23 = vld [vmem:[%s4366_s1 + $0x2a8] sm:$0xff] }
  0x5b   : > { %2804 = vmatmul.mubr.f32.gmra.mxu1 %v3666_v27  ;;  %2834 = vmatprep.subr.mxu0 %v2193_v28 }
  0x5c   : > { %2890 = vmatprep.subr.mxu1 %v2227_v29  ;;  %2835 = vmatpush3.msra.mxu0 %v2193_v28  ;;  %v2262_v28 = vld [vmem:[%s4366_s1 + $0x220] sm:$0xff] }
  0x5d   : > { %2891 = vmatpush3.msra.mxu1 %v2227_v29  ;;  %2836 = vmatprep.subr.mxu0 %v2192_v30  ;;  %v2294_v29 = vld [vmem:[%s4366_s1 + $0x2a0] sm:$0xff] }
  0x5e   : > { %2892 = vmatprep.subr.mxu1 %v2226_v31  ;;  %2837 = vmatpush3.msra.mxu0 %v2192_v30  ;;  %v3811_v30 = vld [vmem:[%s3464_s24 + $0x92] sm:$0xff] }
  0x5f   : > { %2838 = vmatprep.mubr.f32.mxu0 %v575_v32  ;;  %2893 = vmatpush3.msra.mxu1 %v2226_v31  ;;  %v3814_v31 = vld [vmem:[%s3464_s24 + $0x9a] sm:$0xff] }
  0x60   : > { %2894 = vmatprep.mubr.f32.mxu1 %v3492_v41  ;;  %2839 = vmatmul.mubr.f32.vlgmr.msra.gmra.mxu0 %v576_v33  ;;  %v2271_v41 = vld [vmem:[%s4366_s1 + $0x268] sm:$0xff]  ;;  %v2261_v32 = vld [vmem:[%s4366_s1 + $0x218] sm:$0xff] }
  0x61   : > { %2895 = vmatmul.mubr.f32.vlgmr.msra.gmra.mxu1 %v3498_v43  ;;  %2918 = vmatprep.subr.mxu0 %v2273_v34  ;;  %v2303_v43 = vld [vmem:[%s4366_s1 + $0x2e8] sm:$0xff]  ;;  %v2293_v33 = vld [vmem:[%s4366_s1 + $0x298] sm:$0xff] }
  0x62   : > { %2974 = vmatprep.subr.mxu1 %v2305_v35  ;;  %2919 = vmatpush3.msra.mxu0 %v2273_v34  ;;  %v2260_v34 = vld [vmem:[%s4366_s1 + $0x210] sm:$0xff] }
  0x63   : > { %2975 = vmatpush3.msra.mxu1 %v2305_v35  ;;  %2920 = vmatprep.subr.mxu0 %v2272_v36  ;;  %v2292_v35 = vld [vmem:[%s4366_s1 + $0x290] sm:$0xff] }
  0x64   : > { %2976 = vmatprep.subr.mxu1 %v2304_v37  ;;  %2841 = vmatprep.mubr.f32.mxu0 %v3701_v38 }
  0x65   : > { %2897 = vmatprep.mubr.f32.mxu1 %v3520_v49  ;;  %2921 = vmatpush3.msra.mxu0 %v2272_v36  ;;  %v3833_v36 = vld [vmem:[%s3464_s24 + $0xaa] sm:$0xff] }
  0x66   : > { %2977 = vmatpush3.msra.mxu1 %v2304_v37  ;;  %2842 = vmatmul.mubr.f32.gmra.mxu0 %v3704_v39  ;;  %v3836_v37 = vld [vmem:[%s3464_s24 + $0xc0] sm:$0xff] }
  0x67   : > { %2898 = vmatmul.mubr.f32.gmra.mxu1 %v3526_v51  ;;  %2922 = vmatprep.subr.mxu0 %v2271_v41 }
  0x68   : > { %2978 = vmatprep.subr.mxu1 %v2303_v43  ;;  %2923 = vmatpush3.msra.mxu0 %v2271_v41  ;;  %v3839_v41 = vld [vmem:[%s3464_s24 + $0xb2] sm:$0xff] }
  0x69   : > { %2979 = vmatpush3.msra.mxu1 %v2303_v43  ;;  %2924 = vmatprep.subr.mxu0 %v2270_v44  ;;  %v3842_v43 = vld [vmem:[%s3464_s24 + $0xc8] sm:$0xff] }
  0x6a   : > { %2980 = vmatprep.subr.mxu1 %v2302_v45  ;;  %2844 = vmatprep.mubr.f32.mxu0 %v3723_v46 }
  0x6b   : > { %2900 = vmatprep.mubr.f32.mxu1 %v3548_v57  ;;  %2925 = vmatpush3.msra.mxu0 %v2270_v44  ;;  %v2259_v44 = vld [vmem:[%s4366_s1 + $0x208] sm:$0xff] }
  0x6c   : > { %2981 = vmatpush3.msra.mxu1 %v2302_v45  ;;  %2845 = vmatmul.mubr.f32.gmra.mxu0 %v3726_v47  ;;  %v2291_v45 = vld [vmem:[%s4366_s1 + $0x288] sm:$0xff] }
  0x6d   : > { %2901 = vmatmul.mubr.f32.gmra.mxu1 %v3554_v59  ;;  %2926 = vmatprep.subr.mxu0 %v2269_v52 }
  0x6e   : > { %2982 = vmatprep.subr.mxu1 %v2301_v53  ;;  %2927 = vmatpush3.msra.mxu0 %v2269_v52  ;;  %v2258_v52 = vld [vmem:[%s4366_s1 + $0x200] sm:$0xff] }
  0x6f   : > { %2983 = vmatpush3.msra.mxu1 %v2301_v53  ;;  %2928 = vmatprep.subr.mxu0 %v2268_v54  ;;  %v2290_v53 = vld [vmem:[%s4366_s1 + $0x280] sm:$0xff] }
  0x70   : > { %2984 = vmatprep.subr.mxu1 %v2300_v55  ;;  %2847 = vmatprep.mubr.f32.mxu0 %v3745_v60 }
  0x71   : > { %2903 = vmatprep.mubr.f32.mxu1 %v3576_v1  ;;  %2929 = vmatpush3.msra.mxu0 %v2268_v54  ;;  %v2339_v54 = vld [vmem:[%s4366_s1 + $0x378] sm:$0xff] }
  0x72   : > { %2985 = vmatpush3.msra.mxu1 %v2300_v55  ;;  %2848 = vmatmul.mubr.f32.gmra.mxu0 %v3748_v61  ;;  %v2371_v55 = vld [vmem:[%s4366_s1 + $0x3f8] sm:$0xff] }
  0x73   : > { %2904 = vmatmul.mubr.f32.gmra.mxu1 %v3582_v3  ;;  %2930 = vmatprep.subr.mxu0 %v2267_v62 }
  0x74   : > { %2986 = vmatprep.subr.mxu1 %v2299_v63  ;;  %2931 = vmatpush3.msra.mxu0 %v2267_v62  ;;  %v2338_v62 = vld [vmem:[%s4366_s1 + $0x370] sm:$0xff] }
  0x75   : > { %2987 = vmatpush3.msra.mxu1 %v2299_v63  ;;  %2932 = vmatprep.subr.mxu0 %v2266_v4  ;;  %v2368_v63 = vld [vmem:[%s4366_s1 + $0x3e0] sm:$0xff] }
  0x76   : > { %2988 = vmatprep.subr.mxu1 %v2298_v5  ;;  %2850 = vmatprep.mubr.f32.mxu0 %v3767_v6 }
  0x77   : > { %2906 = vmatprep.mubr.f32.mxu1 %v3604_v9  ;;  %2933 = vmatpush3.msra.mxu0 %v2266_v4  ;;  %v2335_v4 = vld [vmem:[%s4366_s1 + $0x358] sm:$0xff] }
  0x78   : > { %2989 = vmatpush3.msra.mxu1 %v2298_v5  ;;  %2851 = vmatmul.mubr.f32.gmra.mxu0 %v3770_v7  ;;  %v2367_v5 = vld [vmem:[%s4366_s1 + $0x3d8] sm:$0xff] }
  0x79   : > { %2907 = vmatmul.mubr.f32.gmra.mxu1 %v3610_v11  ;;  %2934 = vmatprep.subr.mxu0 %v2265_v12 }
  0x7a   : > { %2990 = vmatprep.subr.mxu1 %v2297_v13  ;;  %2935 = vmatpush3.msra.mxu0 %v2265_v12  ;;  %v2334_v12 = vld [vmem:[%s4366_s1 + $0x350] sm:$0xff] }
  0x7b   : > { %2991 = vmatpush3.msra.mxu1 %v2297_v13  ;;  %2936 = vmatprep.subr.mxu0 %v2264_v14  ;;  %v2366_v13 = vld [vmem:[%s4366_s1 + $0x3d0] sm:$0xff] }
  0x7c   : > { %2992 = vmatprep.subr.mxu1 %v2296_v15  ;;  %2853 = vmatprep.mubr.f32.mxu0 %v3789_v20 }
  0x7d   : > { %2909 = vmatprep.mubr.f32.mxu1 %v3632_v17  ;;  %2937 = vmatpush3.msra.mxu0 %v2264_v14  ;;  %v2333_v14 = vld [vmem:[%s4366_s1 + $0x348] sm:$0xff] }
  0x7e   : > { %2993 = vmatpush3.msra.mxu1 %v2296_v15  ;;  %2854 = vmatmul.mubr.f32.gmra.mxu0 %v3792_v21  ;;  %v2365_v15 = vld [vmem:[%s4366_s1 + $0x3c8] sm:$0xff] }
  0x7f   : > { %2910 = vmatmul.mubr.f32.gmra.mxu1 %v3638_v19  ;;  %2938 = vmatprep.subr.mxu0 %v2263_v22 }
  0x80   : > { %2994 = vmatprep.subr.mxu1 %v2295_v23  ;;  %2939 = vmatpush3.msra.mxu0 %v2263_v22  ;;  %v2332_v22 = vld [vmem:[%s4366_s1 + $0x340] sm:$0xff] }
  0x81   : > { %2995 = vmatpush3.msra.mxu1 %v2295_v23  ;;  %2940 = vmatprep.subr.mxu0 %v2262_v28  ;;  %v2364_v23 = vld [vmem:[%s4366_s1 + $0x3c0] sm:$0xff] }
  0x82   : > { %2996 = vmatprep.subr.mxu1 %v2294_v29  ;;  %2856 = vmatprep.mubr.f32.mxu0 %v3811_v30 }
  0x83   : > { %2912 = vmatprep.mubr.f32.mxu1 %v3660_v25  ;;  %2941 = vmatpush3.msra.mxu0 %v2262_v28  ;;  %v2331_v28 = vld [vmem:[%s4366_s1 + $0x338] sm:$0xff] }
  0x84   : > { %2997 = vmatpush3.msra.mxu1 %v2294_v29  ;;  %2857 = vmatmul.mubr.f32.gmra.mxu0 %v3814_v31  ;;  %v2363_v29 = vld [vmem:[%s4366_s1 + $0x3b8] sm:$0xff] }
  0x85   : > { %2913 = vmatmul.mubr.f32.gmra.mxu1 %v3666_v27  ;;  %2942 = vmatprep.subr.mxu0 %v2261_v32 }
  0x86   : > { %2998 = vmatprep.subr.mxu1 %v2293_v33  ;;  %2943 = vmatpush3.msra.mxu0 %v2261_v32  ;;  %v2330_v32 = vld [vmem:[%s4366_s1 + $0x330] sm:$0xff] }
  0x87   : > { %2999 = vmatpush3.msra.mxu1 %v2293_v33  ;;  %2944 = vmatprep.subr.mxu0 %v2260_v34  ;;  %v2362_v33 = vld [vmem:[%s4366_s1 + $0x3b0] sm:$0xff] }
  0x88   : > { %3000 = vmatprep.subr.mxu1 %v2292_v35  ;;  %2859 = vmatprep.mubr.f32.mxu0 %v3833_v36 }
  0x89   : > { %2915 = vmatprep.mubr.f32.mxu1 %v3836_v37  ;;  %2945 = vmatpush3.msra.mxu0 %v2260_v34  ;;  %v2329_v34 = vld [vmem:[%s4366_s1 + $0x328] sm:$0xff] }
  0x8a   : > { %3001 = vmatpush3.msra.mxu1 %v2292_v35  ;;  %2860 = vmatmul.mubr.f32.gmra.mxu0 %v3839_v41  ;;  %v2361_v35 = vld [vmem:[%s4366_s1 + $0x3a8] sm:$0xff] }
  0x8b   : > { %2916 = vmatmul.mubr.f32.gmra.mxu1 %v3842_v43  ;;  %2946 = vmatprep.subr.mxu0 %v2259_v44 }
  0x8c   : > { %3002 = vmatprep.subr.mxu1 %v2291_v45  ;;  %2947 = vmatpush3.msra.mxu0 %v2259_v44  ;;  %v2328_v44 = vld [vmem:[%s4366_s1 + $0x320] sm:$0xff] }
  0x8d   : > { %3003 = vmatpush3.msra.mxu1 %v2291_v45  ;;  %2948 = vmatprep.subr.mxu0 %v2258_v52  ;;  %v2360_v45 = vld [vmem:[%s4366_s1 + $0x3a0] sm:$0xff] }
  0x8e   : > { %3004 = vmatprep.subr.mxu1 %v2290_v53  ;;  %2949 = vmatpush3.msra.mxu0 %v2258_v52  ;;  %v2327_v52 = vld [vmem:[%s4366_s1 + $0x318] sm:$0xff] }
  0x8f   : > { %2950 = vmatprep.mubr.f32.mxu0 %v3489_v40  ;;  %3005 = vmatpush3.msra.mxu1 %v2290_v53  ;;  %v2370_v40 = vld [vmem:[%s4366_s1 + $0x3f0] sm:$0xff]  ;;  %v2359_v53 = vld [vmem:[%s4366_s1 + $0x398] sm:$0xff] }
  0x90   : > { %3006 = vmatprep.mubr.f32.mxu1 %v3701_v38  ;;  %2951 = vmatmul.mubr.f32.vlgmr.msra.gmra.mxu0 %v3495_v42  ;;  %v2337_v42 = vld [vmem:[%s4366_s1 + $0x368] sm:$0xff] }
  0x91   : > { %3007 = vmatmul.mubr.f32.vlgmr.msra.gmra.mxu1 %v3704_v39  ;;  %3030 = vmatprep.subr.mxu0 %v2339_v54  ;;  %v2369_v38 = vld [vmem:[%s4366_s1 + $0x3e8] sm:$0xff]  ;;  %v2336_v39 = vld [vmem:[%s4366_s1 + $0x360] sm:$0xff] }
  0x92   : > { %3086 = vmatprep.subr.mxu1 %v2371_v55  ;;  %3031 = vmatpush3.msra.mxu0 %v2339_v54  ;;  %v2326_v54 = vld [vmem:[%s4366_s1 + $0x310] sm:$0xff] }
  0x93   : > { %3087 = vmatpush3.msra.mxu1 %v2371_v55  ;;  %3032 = vmatprep.subr.mxu0 %v2338_v62  ;;  %v2358_v55 = vld [vmem:[%s4366_s1 + $0x390] sm:$0xff] }
  0x94   : > { %3088 = vmatprep.subr.mxu1 %v2370_v40  ;;  %2953 = vmatprep.mubr.f32.mxu0 %v3517_v48 }
  0x95   : > { %3009 = vmatprep.mubr.f32.mxu1 %v3723_v46  ;;  %3033 = vmatpush3.msra.mxu0 %v2338_v62  ;;  %v3973_v62 = vld [vmem:[%s3464_s24 + $0xc1] sm:$0xff] }
  0x96   : > { %3089 = vmatpush3.msra.mxu1 %v2370_v40  ;;  %2954 = vmatmul.mubr.f32.gmra.mxu0 %v3523_v50  ;;  %v3976_v40 = vld [vmem:[%s3464_s24 + $0xc2] sm:$0xff] }
  0x97   : > { %3010 = vmatmul.mubr.f32.gmra.mxu1 %v3726_v47  ;;  %3034 = vmatprep.subr.mxu0 %v2337_v42 }
  0x98   : > { %3090 = vmatprep.subr.mxu1 %v2369_v38  ;;  %3035 = vmatpush3.msra.mxu0 %v2337_v42  ;;  %v3979_v42 = vld [vmem:[%s3464_s24 + $0xc9] sm:$0xff] }
  0x99   : > { %3091 = vmatpush3.msra.mxu1 %v2369_v38  ;;  %3036 = vmatprep.subr.mxu0 %v2336_v39  ;;  %v3982_v38 = vld [vmem:[%s3464_s24 + $0xca] sm:$0xff] }
  0x9a   : > { %3092 = vmatprep.subr.mxu1 %v2368_v63  ;;  %2956 = vmatprep.mubr.f32.mxu0 %v3545_v56 }
  0x9b   : > { %3012 = vmatprep.mubr.f32.mxu1 %v3745_v60  ;;  %3037 = vmatpush3.msra.mxu0 %v2336_v39  ;;  %v2325_v39 = vld [vmem:[%s4366_s1 + $0x308] sm:$0xff] }
  0x9c   : > { %3093 = vmatpush3.msra.mxu1 %v2368_v63  ;;  %2957 = vmatmul.mubr.f32.gmra.mxu0 %v3551_v58  ;;  %v2357_v63 = vld [vmem:[%s4366_s1 + $0x388] sm:$0xff] }
  0x9d   : > { %3013 = vmatmul.mubr.f32.gmra.mxu1 %v3748_v61  ;;  %3038 = vmatprep.subr.mxu0 %v2335_v4 }
  0x9e   : > { %3094 = vmatprep.subr.mxu1 %v2367_v5  ;;  %3039 = vmatpush3.msra.mxu0 %v2335_v4  ;;  %v2324_v4 = vld [vmem:[%s4366_s1 + $0x300] sm:$0xff] }
  0x9f   : > { %3095 = vmatpush3.msra.mxu1 %v2367_v5  ;;  %3040 = vmatprep.subr.mxu0 %v2334_v12  ;;  %v2356_v5 = vld [vmem:[%s4366_s1 + $0x380] sm:$0xff] }
  0xa0   : > { %3096 = vmatprep.subr.mxu1 %v2366_v13  ;;  %2959 = vmatprep.mubr.f32.mxu0 %v3573_v0 }
  0xa1   : > { %3015 = vmatprep.mubr.f32.mxu1 %v3767_v6  ;;  %3041 = vmatpush3.msra.mxu0 %v2334_v12  ;;  %v2403_v12 = vld [vmem:[%s4366_s1 + $0x478] sm:$0xff] }
  0xa2   : > { %3097 = vmatpush3.msra.mxu1 %v2366_v13  ;;  %2960 = vmatmul.mubr.f32.gmra.mxu0 %v3579_v2  ;;  %v2402_v13 = vld [vmem:[%s4366_s1 + $0x470] sm:$0xff] }
  0xa3   : > { %3016 = vmatmul.mubr.f32.gmra.mxu1 %v3770_v7  ;;  %3042 = vmatprep.subr.mxu0 %v2333_v14 }
  0xa4   : > { %3098 = vmatprep.subr.mxu1 %v2365_v15  ;;  %3043 = vmatpush3.msra.mxu0 %v2333_v14 }
  0xa5   : > { %3099 = vmatpush3.msra.mxu1 %v2365_v15  ;;  %3044 = vmatprep.subr.mxu0 %v2332_v22 }
  0xa6   : > { %3100 = vmatprep.subr.mxu1 %v2364_v23  ;;  %2962 = vmatprep.mubr.f32.mxu0 %v3601_v8 }
  0xa7   : > { %3018 = vmatprep.mubr.f32.mxu1 %v3789_v20  ;;  %3045 = vmatpush3.msra.mxu0 %v2332_v22 }
  0xa8   : > { %3101 = vmatpush3.msra.mxu1 %v2364_v23  ;;  %2963 = vmatmul.mubr.f32.gmra.mxu0 %v3607_v10 }
  0xa9   : > { %3019 = vmatmul.mubr.f32.gmra.mxu1 %v3792_v21  ;;  %3046 = vmatprep.subr.mxu0 %v2331_v28 }
  0xaa   : > { %3102 = vmatprep.subr.mxu1 %v2363_v29  ;;  %3047 = vmatpush3.msra.mxu0 %v2331_v28 }
  0xab   : > { %3103 = vmatpush3.msra.mxu1 %v2363_v29  ;;  %3048 = vmatprep.subr.mxu0 %v2330_v32 }
  0xac   : > { %3104 = vmatprep.subr.mxu1 %v2362_v33  ;;  %2965 = vmatprep.mubr.f32.mxu0 %v3629_v16 }
  0xad   : > { %3021 = vmatprep.mubr.f32.mxu1 %v3811_v30  ;;  %3049 = vmatpush3.msra.mxu0 %v2330_v32 }
  0xae   : > { %3105 = vmatpush3.msra.mxu1 %v2362_v33  ;;  %2966 = vmatmul.mubr.f32.gmra.mxu0 %v3635_v18 }
  0xaf   : > { %3022 = vmatmul.mubr.f32.gmra.mxu1 %v3814_v31  ;;  %3050 = vmatprep.subr.mxu0 %v2329_v34 }
  0xb0   : > { %3106 = vmatprep.subr.mxu1 %v2361_v35  ;;  %3051 = vmatpush3.msra.mxu0 %v2329_v34 }
  0xb1   : > { %3107 = vmatpush3.msra.mxu1 %v2361_v35  ;;  %3052 = vmatprep.subr.mxu0 %v2328_v44 }
  0xb2   : > { %3108 = vmatprep.subr.mxu1 %v2360_v45  ;;  %2968 = vmatprep.mubr.f32.mxu0 %v3657_v24 }
  0xb3   : > { %3024 = vmatprep.mubr.f32.mxu1 %v3833_v36  ;;  %3053 = vmatpush3.msra.mxu0 %v2328_v44 }
  0xb4   : > { %3109 = vmatpush3.msra.mxu1 %v2360_v45  ;;  %2969 = vmatmul.mubr.f32.gmra.mxu0 %v3663_v26 }
  0xb5   : > { %3025 = vmatmul.mubr.f32.gmra.mxu1 %v3839_v41  ;;  %3054 = vmatprep.subr.mxu0 %v2327_v52 }
  0xb6   : > { %3110 = vmatprep.subr.mxu1 %v2359_v53  ;;  %3055 = vmatpush3.msra.mxu0 %v2327_v52 }
  0xb7   : > { %3111 = vmatpush3.msra.mxu1 %v2359_v53  ;;  %3056 = vmatprep.subr.mxu0 %v2326_v54 }
  0xb8   : > { %3112 = vmatprep.subr.mxu1 %v2358_v55  ;;  %2971 = vmatprep.mubr.f32.mxu0 %v3973_v62 }
  0xb9   : > { %3027 = vmatprep.mubr.f32.mxu1 %v3976_v40  ;;  %3057 = vmatpush3.msra.mxu0 %v2326_v54 }
  0xba   : > { %3113 = vmatpush3.msra.mxu1 %v2358_v55  ;;  %2972 = vmatmul.mubr.f32.gmra.mxu0 %v3979_v42 }
  0xbb   : > { %3028 = vmatmul.mubr.f32.gmra.mxu1 %v3982_v38  ;;  %3058 = vmatprep.subr.mxu0 %v2325_v39 }
  0xbc   : > { %3114 = vmatprep.subr.mxu1 %v2357_v63  ;;  %3059 = vmatpush3.msra.mxu0 %v2325_v39 }
  0xbd   : > { %3115 = vmatpush3.msra.mxu1 %v2357_v63  ;;  %3060 = vmatprep.subr.mxu0 %v2324_v4 }
  0xbe   : > { %3116 = vmatprep.subr.mxu1 %v2356_v5  ;;  %3061 = vmatpush3.msra.mxu0 %v2324_v4 }
  0xbf   : > { %3062 = vmatprep.mubr.f32.mxu0 %v3520_v49  ;;  %3117 = vmatpush3.msra.mxu1 %v2356_v5  ;;  %v2400_v49 = vld [vmem:[%s4366_s1 + $0x460] sm:$0xff] }
  0xc0   : > { %3118 = vmatprep.mubr.f32.mxu1 %v3517_v48  ;;  %3063 = vmatmul.mubr.f32.vlgmr.msra.gmra.mxu0 %v3526_v51  ;;  %v2401_v48 = vld [vmem:[%s4366_s1 + $0x468] sm:$0xff]  ;;  %v2398_v51 = vld [vmem:[%s4366_s1 + $0x450] sm:$0xff] }
  0xc1   : > { %3119 = vmatmul.mubr.f32.vlgmr.msra.gmra.mxu1 %v3523_v50  ;;  %3142 = vmatprep.subr.mxu0 %v2403_v12  ;;  %v2399_v50 = vld [vmem:[%s4366_s1 + $0x458] sm:$0xff] }
  0xc2   : > { %3198 = vmatprep.subr.mxu1 %v2403_v12  ;;  %3143 = vmatpush3.msra.mxu0 %v2403_v12 }
  0xc3   : > { %3214 = vmatpush3.msra.mxu1 %v2403_v12  ;;  %3144 = vmatprep.subr.mxu0 %v2402_v13 }
  0xc4   : > { %3199 = vmatprep.subr.mxu1 %v2402_v13  ;;  %3065 = vmatprep.mubr.f32.mxu0 %v3548_v57  ;;  %v2396_v57 = vld [vmem:[%s4366_s1 + $0x440] sm:$0xff] }
  0xc5   : > { %3121 = vmatprep.mubr.f32.mxu1 %v3545_v56  ;;  %3145 = vmatpush3.msra.mxu0 %v2402_v13  ;;  %v2397_v56 = vld [vmem:[%s4366_s1 + $0x448] sm:$0xff] }
  0xc6   : > { %3215 = vmatpush3.msra.mxu1 %v2402_v13  ;;  %3066 = vmatmul.mubr.f32.gmra.mxu0 %v3554_v59  ;;  %v2394_v59 = vld [vmem:[%s4366_s1 + $0x430] sm:$0xff] }
  0xc7   : > { %3122 = vmatmul.mubr.f32.gmra.mxu1 %v3551_v58  ;;  %3146 = vmatprep.subr.mxu0 %v2401_v48  ;;  %v2395_v58 = vld [vmem:[%s4366_s1 + $0x438] sm:$0xff] }
  0xc8   : > { %3200 = vmatprep.subr.mxu1 %v2401_v48  ;;  %3147 = vmatpush3.msra.mxu0 %v2401_v48 }
  0xc9   : > { %3216 = vmatpush3.msra.mxu1 %v2401_v48  ;;  %3148 = vmatprep.subr.mxu0 %v2400_v49 }
  0xca   : > { %3201 = vmatprep.subr.mxu1 %v2400_v49  ;;  %3068 = vmatprep.mubr.f32.mxu0 %v3576_v1  ;;  %v2392_v1 = vld [vmem:[%s4366_s1 + $0x420] sm:$0xff] }
  0xcb   : > { %3124 = vmatprep.mubr.f32.mxu1 %v3573_v0  ;;  %3149 = vmatpush3.msra.mxu0 %v2400_v49  ;;  %v2393_v0 = vld [vmem:[%s4366_s1 + $0x428] sm:$0xff] }
  0xcc   : > { %3217 = vmatpush3.msra.mxu1 %v2400_v49  ;;  %3069 = vmatmul.mubr.f32.gmra.mxu0 %v3582_v3  ;;  %v2390_v3 = vld [vmem:[%s4366_s1 + $0x410] sm:$0xff] }
  0xcd   : > { %3125 = vmatmul.mubr.f32.gmra.mxu1 %v3579_v2  ;;  %3150 = vmatprep.subr.mxu0 %v2399_v50  ;;  %v2391_v2 = vld [vmem:[%s4366_s1 + $0x418] sm:$0xff] }
  0xce   : > { %3202 = vmatprep.subr.mxu1 %v2399_v50  ;;  %3151 = vmatpush3.msra.mxu0 %v2399_v50 }
  0xcf   : > { %3218 = vmatpush3.msra.mxu1 %v2399_v50  ;;  %3152 = vmatprep.subr.mxu0 %v2398_v51 }
  0xd0   : > { %3203 = vmatprep.subr.mxu1 %v2398_v51  ;;  %3071 = vmatprep.mubr.f32.mxu0 %v3604_v9  ;;  %v2354_v9 = vld [vmem:[%s3464_s24 + $0xd9] sm:$0xff] }
  0xd1   : > { %3127 = vmatprep.mubr.f32.mxu1 %v3601_v8  ;;  %3153 = vmatpush3.msra.mxu0 %v2398_v51  ;;  %v2322_v8 = vld [vmem:[%s3464_s24 + $0xd8] sm:$0xff] }
  0xd2   : > { %3219 = vmatpush3.msra.mxu1 %v2398_v51  ;;  %3072 = vmatmul.mubr.f32.gmra.mxu0 %v3610_v11  ;;  %v2355_v11 = vld [vmem:[%s3464_s24 + $0xe1] sm:$0xff] }
  0xd3   : > { %3128 = vmatmul.mubr.f32.gmra.mxu1 %v3607_v10  ;;  %3154 = vmatprep.subr.mxu0 %v2397_v56  ;;  %v2323_v10 = vld [vmem:[%s3464_s24 + $0xe0] sm:$0xff] }
  0xd4   : > { %3204 = vmatprep.subr.mxu1 %v2397_v56  ;;  %3155 = vmatpush3.msra.mxu0 %v2397_v56 }
  0xd5   : > { %3220 = vmatpush3.msra.mxu1 %v2397_v56  ;;  %3156 = vmatprep.subr.mxu0 %v2396_v57 }
  0xd6   : > { %3205 = vmatprep.subr.mxu1 %v2396_v57  ;;  %3074 = vmatprep.mubr.f32.mxu0 %v3632_v17  ;;  %v2388_v17 = vld [vmem:[%s4366_s1 + $0x400] sm:$0xff] }
  0xd7   : > { %3130 = vmatprep.mubr.f32.mxu1 %v3629_v16  ;;  %3157 = vmatpush3.msra.mxu0 %v2396_v57  ;;  %v2389_v16 = vld [vmem:[%s4366_s1 + $0x408] sm:$0xff] }
  0xd8   : > { %3221 = vmatpush3.msra.mxu1 %v2396_v57  ;;  %3075 = vmatmul.mubr.f32.gmra.mxu0 %v3638_v19 }
  0xd9   : > { %3131 = vmatmul.mubr.f32.gmra.mxu1 %v3635_v18  ;;  %3158 = vmatprep.subr.mxu0 %v2395_v58 }
  0xda   : > { %3206 = vmatprep.subr.mxu1 %v2395_v58  ;;  %3159 = vmatpush3.msra.mxu0 %v2395_v58 }
  0xdb   : > { %3222 = vmatpush3.msra.mxu1 %v2395_v58  ;;  %3160 = vmatprep.subr.mxu0 %v2394_v59 }
  0xdc   : > { %3207 = vmatprep.subr.mxu1 %v2394_v59  ;;  %3077 = vmatprep.mubr.f32.mxu0 %v3660_v25 }
  0xdd   : > { %3133 = vmatprep.mubr.f32.mxu1 %v3657_v24  ;;  %3161 = vmatpush3.msra.mxu0 %v2394_v59 }
  0xde   : > { %3223 = vmatpush3.msra.mxu1 %v2394_v59  ;;  %3078 = vmatmul.mubr.f32.gmra.mxu0 %v3666_v27 }
  0xdf   : > { %3134 = vmatmul.mubr.f32.gmra.mxu1 %v3663_v26  ;;  %3162 = vmatprep.subr.mxu0 %v2393_v0 }
  0xe0   : > { %3208 = vmatprep.subr.mxu1 %v2393_v0  ;;  %3163 = vmatpush3.msra.mxu0 %v2393_v0 }
  0xe1   : > { %3224 = vmatpush3.msra.mxu1 %v2393_v0  ;;  %3164 = vmatprep.subr.mxu0 %v2392_v1 }
  0xe2   : > { %3209 = vmatprep.subr.mxu1 %v2392_v1  ;;  %3080 = vmatprep.mubr.f32.mxu0 %v3836_v37 }
  0xe3   : > { %3136 = vmatprep.mubr.f32.mxu1 %v3973_v62  ;;  %3165 = vmatpush3.msra.mxu0 %v2392_v1 }
  0xe4   : > { %3225 = vmatpush3.msra.mxu1 %v2392_v1  ;;  %3081 = vmatmul.mubr.f32.gmra.mxu0 %v3842_v43 }
  0xe5   : > { %3137 = vmatmul.mubr.f32.gmra.mxu1 %v3979_v42  ;;  %3166 = vmatprep.subr.mxu0 %v2391_v2 }
  0xe6   : > { %3210 = vmatprep.subr.mxu1 %v2391_v2  ;;  %3167 = vmatpush3.msra.mxu0 %v2391_v2 }
  0xe7   : > { %3226 = vmatpush3.msra.mxu1 %v2391_v2  ;;  %3168 = vmatprep.subr.mxu0 %v2390_v3 }
  0xe8   : > { %3211 = vmatprep.subr.mxu1 %v2390_v3  ;;  %3083 = vmatprep.mubr.f32.mxu0 %v2322_v8 }
  0xe9   : > { %3139 = vmatprep.mubr.f32.mxu1 %v2354_v9  ;;  %3169 = vmatpush3.msra.mxu0 %v2390_v3 }
  0xea   : > { %3227 = vmatpush3.msra.mxu1 %v2390_v3  ;;  %3084 = vmatmul.mubr.f32.gmra.mxu0 %v2323_v10 }
  0xeb   : > { %3140 = vmatmul.mubr.f32.gmra.mxu1 %v2355_v11  ;;  %3170 = vmatprep.subr.mxu0 %v2389_v16 }
  0xec   : > { %3212 = vmatprep.subr.mxu1 %v2389_v16  ;;  %3171 = vmatpush3.msra.mxu0 %v2389_v16 }
  0xed   : > { %3228 = vmatpush3.msra.mxu1 %v2389_v16  ;;  %3172 = vmatprep.subr.mxu0 %v2388_v17 }
  0xee   : > { %3213 = vmatprep.subr.mxu1 %v2388_v17  ;;  %3173 = vmatpush3.msra.mxu0 %v2388_v17 }
  0xef   : > { %3229 = vmatpush3.msra.mxu1 %v2388_v17  ;;  %3174 = vmatprep.mubr.f32.mxu0 %v3723_v46  ;;  %v2386_v46 = vld [vmem:[%s3464_s24 + $0xda] sm:$0xff] }
  0xf0   : > { %3186 = vmatprep.mubr.f32.mxu1 %v3811_v30  ;;  %3175 = vmatmul.mubr.f32.vlgmr.msra.gmra.mxu0 %v3726_v47  ;;  %v2728_v18 = vpop.f32.mrf.mxu0 }
  0xf1   : > { %3187 = vmatmul.mubr.f32.vlgmr.msra.gmra.mxu1 %v3814_v31  ;;  %v2784_v19 = vpop.f32.mrf.mxu1  ;;  %3177 = vmatprep.mubr.f32.mxu0 %v3745_v60 }
  0xf2   : > { %3189 = vmatprep.mubr.f32.mxu1 %v3833_v36  ;;  %v502_v24 = vadd.f32 %v2784_v19, %v2728_v18  ;;  %v351_v25 = vpop.f32.mrf.mxu0 }
  0xf3   : > { %v496_v26 = vpop.f32.mrf.mxu1 }
  0xf4   : > { %v497_v27 = vadd.f32 %v496_v26, %v351_v25  ;;  %3178 = vmatmul.mubr.f32.gmra.mxu0 %v3748_v61  ;;  %v2387_v61 = vld [vmem:[%s3464_s24 + $0xe2] sm:$0xff]  ;;  %s2168_s24 = sshll.u32 %s3293_s12, 3  ;;  %s4420_s12 = smov (!%p211_p7, %s3293_s12), 1 }
  0xf5   : > { %3190 = vmatmul.mubr.f32.gmra.mxu1 %v3839_v41  ;;  %3180 = vmatprep.mubr.f32.mxu0 %v3767_v6  ;;  %p201_p6 = scmp.lt.s32.totalorder %s2168_s24, 15  ;;  %s214_s6 = sadd.s32 %s2172_s5, %s4420_s12 }
  0xf6   : > { %3192 = vmatprep.mubr.f32.mxu1 %v3976_v40  ;;  %v2731_v47 = vpop.f32.mrf.mxu0  ;;  %s2173_s7 = sshll.u32 %s214_s6, 1 }
  0xf7   : > { %v2787_v30 = vpop.f32.mrf.mxu1  ;;  %s4418_s24 = smov (!%p201_p6, %s2168_s24), 15  ;;  %s216_s10 = scalar_lea.vmem %s4368_s3, %s2173_s7 }
  0xf8   : > { %v512_v31 = vadd.f32 %v2787_v30, %v2731_v47  ;;  %3181 = vmatmul.mubr.f32.gmra.mxu0 %v3770_v7  ;;  %v361_v60 = vpop.f32.mrf.mxu0  ;;  %s2169_s25 = sshll.u32 %s4418_s24, 1 }
  0xf9   : > { %3193 = vmatmul.mubr.f32.gmra.mxu1 %v3982_v38  ;;  %v506_v36 = vpop.f32.mrf.mxu1  ;;  %3183 = vmatprep.mubr.f32.mxu0 %v3789_v20  ;;  %s4243_s27 = sadd.s32 %s2170_s26, %s2169_s25 }
  0xfa   : > { %3195 = vmatprep.mubr.f32.mxu1 %v2386_v46  ;;  %v507_v37 = vadd.f32 %v506_v36, %v361_v60  ;;  %s2171_s28 = sshll.u32 %s4243_s27, 3 }
  0xfb   : > { %s4274_s4 = scalar_lea.vmem %s4367_s2, %s2171_s28 }
  0xfc   : > { %3184 = vmatmul.mubr.f32.gmra.mxu0 %v3792_v21  ;;  %v2734_v6 = vpop.f32.mrf.mxu0 }
  0xfd   : > { %3196 = vmatmul.mubr.f32.gmra.mxu1 %v2387_v61  ;;  %v2790_v41 = vpop.f32.mrf.mxu1 }
  0xfe   : > { %v522_v43 = vadd.f32 %v2790_v41, %v2734_v6  ;;  %v371_v14 = vpop.f32.mrf.mxu0 }
  0xff   : > { %v516_v15 = vpop.f32.mrf.mxu1 }
 0x100   : > { %v517_v22 = vadd.f32 %v516_v15, %v371_v14 }
 0x102   : > { %v2737_v23 = vpop.f32.mrf.mxu0 }
 0x103   : > { %v2793_v7 = vpop.f32.mrf.mxu1 }
 0x104   : > { %v532_v28 = vadd.f32 %v2793_v7, %v2737_v23  ;;  %v381_v29 = vpop.f32.mrf.mxu0 }
 0x105   : > { %v526_v32 = vpop.f32.mrf.mxu1 }
 0x106   : > { %v527_v33 = vadd.f32 %v526_v32, %v381_v29 }
 0x108   : > { %v2740_v34 = vpop.f32.mrf.mxu0 }
 0x109   : > { %v2796_v20 = vpop.f32.mrf.mxu1 }
 0x10a   : > { %v542_v35 = vadd.f32 %v2796_v20, %v2740_v34  ;;  %v391_v44 = vpop.f32.mrf.mxu0 }
 0x10b   : > { %v536_v45 = vpop.f32.mrf.mxu1 }
 0x10c   : > { %v537_v52 = vadd.f32 %v536_v45, %v391_v44 }
 0x10e   : > { %v2743_v21 = vpop.f32.mrf.mxu0 }
 0x10f   : > { %v2799_v53 = vpop.f32.mrf.mxu1 }
 0x110   : > { %v552_v54 = vadd.f32 %v2799_v53, %v2743_v21  ;;  %v401_v55 = vpop.f32.mrf.mxu0 }
 0x111   : > { %v546_v62 = vpop.f32.mrf.mxu1 }
 0x112   : > { %v547_v40 = vadd.f32 %v546_v62, %v401_v55 }
 0x114   : > { %v2746_v42 = vpop.f32.mrf.mxu0 }
 0x115   : > { %v2802_v38 = vpop.f32.mrf.mxu1 }
 0x116   : > { %v562_v39 = vadd.f32 %v2802_v38, %v2746_v42  ;;  %v411_v63 = vpop.f32.mrf.mxu0 }
 0x117   : > { %v556_v4 = vpop.f32.mrf.mxu1 }
 0x118   : > { %v557_v5 = vadd.f32 %v556_v4, %v411_v63 }
 0x11a   : > { %v2749_v12 = vpop.f32.mrf.mxu0 }
 0x11b   : > { %v2805_v13 = vpop.f32.mrf.mxu1 }
 0x11c   : > { %v572_v48 = vadd.f32 %v2805_v13, %v2749_v12  ;;  %v421_v49 = vpop.f32.mrf.mxu0 }
 0x11d   : > { %v566_v50 = vpop.f32.mrf.mxu1 }
 0x11e   : > { %v4096_v51 = vadd.f32 %v566_v50, %v421_v49 }
 0x120   : > { %v2840_v56 = vpop.f32.mrf.mxu0 }
 0x121   : > { %v2896_v57 = vpop.f32.mrf.mxu1  ;;  %v754_v58 = vadd.f32 %v2840_v56, %v502_v24 }
 0x122   : > { %v674_v59 = vpop.f32.mrf.mxu0 }
 0x123   : > { %v871_v0 = vpop.f32.mrf.mxu1  ;;  %v4098_v1 = vadd.f32 %v2896_v57, %v754_v58  ;;  %v753_v2 = vadd.f32 %v674_v59, %v497_v27 }
 0x125   : > { %v4100_v3 = vadd.f32 %v871_v0, %v753_v2 }
 0x126   : > { %v2843_v8 = vpop.f32.mrf.mxu0 }
 0x127   : > { %v2899_v9 = vpop.f32.mrf.mxu1  ;;  %v756_v10 = vadd.f32 %v2843_v8, %v512_v31 }
 0x128   : > { %v684_v11 = vpop.f32.mrf.mxu0 }
 0x129   : > { %v881_v16 = vpop.f32.mrf.mxu1  ;;  %v4102_v17 = vadd.f32 %v2899_v9, %v756_v10  ;;  %v755_v18 = vadd.f32 %v684_v11, %v507_v37 }
 0x12b   : > { %v4104_v19 = vadd.f32 %v881_v16, %v755_v18 }
 0x12c   : > { %v2846_v25 = vpop.f32.mrf.mxu0 }
 0x12d   : > { %v2902_v26 = vpop.f32.mrf.mxu1  ;;  %v758_v24 = vadd.f32 %v2846_v25, %v522_v43 }
 0x12e   : > { %v694_v46 = vpop.f32.mrf.mxu0 }
 0x12f   : > { %v891_v47 = vpop.f32.mrf.mxu1  ;;  %v4106_v30 = vadd.f32 %v2902_v26, %v758_v24  ;;  %v757_v27 = vadd.f32 %v694_v46, %v517_v22 }
 0x131   : > { %v4108_v60 = vadd.f32 %v891_v47, %v757_v27 }
 0x132   : > { %v2849_v36 = vpop.f32.mrf.mxu0 }
 0x133   : > { %v2905_v61 = vpop.f32.mrf.mxu1  ;;  %v760_v31 = vadd.f32 %v2849_v36, %v532_v28 }
 0x134   : > { %v704_v6 = vpop.f32.mrf.mxu0 }
 0x135   : > { %v901_v41 = vpop.f32.mrf.mxu1  ;;  %v4110_v14 = vadd.f32 %v2905_v61, %v760_v31  ;;  %v759_v37 = vadd.f32 %v704_v6, %v527_v33 }
 0x137   : > { %v4112_v15 = vadd.f32 %v901_v41, %v759_v37 }
 0x138   : > { %v2852_v23 = vpop.f32.mrf.mxu0 }
 0x139   : > { %v2908_v7 = vpop.f32.mrf.mxu1  ;;  %v762_v43 = vadd.f32 %v2852_v23, %v542_v35 }
 0x13a   : > { %v714_v29 = vpop.f32.mrf.mxu0 }
 0x13b   : > { %v911_v32 = vpop.f32.mrf.mxu1  ;;  %v4114_v34 = vadd.f32 %v2908_v7, %v762_v43  ;;  %v761_v22 = vadd.f32 %v714_v29, %v537_v52 }
 0x13d   : > { %v4116_v20 = vadd.f32 %v911_v32, %v761_v22 }
 0x13e   : > { %v2855_v44 = vpop.f32.mrf.mxu0 }
 0x13f   : > { %v2911_v45 = vpop.f32.mrf.mxu1  ;;  %v764_v28 = vadd.f32 %v2855_v44, %v552_v54 }
 0x140   : > { %v724_v21 = vpop.f32.mrf.mxu0 }
 0x141   : > { %v921_v53 = vpop.f32.mrf.mxu1  ;;  %v4118_v55 = vadd.f32 %v2911_v45, %v764_v28  ;;  %v763_v33 = vadd.f32 %v724_v21, %v547_v40 }
 0x143   : > { %v4120_v62 = vadd.f32 %v921_v53, %v763_v33 }
 0x144   : > { %v2858_v42 = vpop.f32.mrf.mxu0 }
 0x145   : > { %v2914_v38 = vpop.f32.mrf.mxu1  ;;  %v766_v35 = vadd.f32 %v2858_v42, %v562_v39 }
 0x146   : > { %v734_v63 = vpop.f32.mrf.mxu0 }
 0x147   : > { %v931_v4 = vpop.f32.mrf.mxu1  ;;  %v4122_v12 = vadd.f32 %v2914_v38, %v766_v35  ;;  %v765_v52 = vadd.f32 %v734_v63, %v557_v5 }
 0x149   : > { %v4124_v13 = vadd.f32 %v931_v4, %v765_v52 }
 0x14a   : > { %v2861_v49 = vpop.f32.mrf.mxu0 }
 0x14b   : > { %v2917_v50 = vpop.f32.mrf.mxu1  ;;  %v768_v54 = vadd.f32 %v2861_v49, %v572_v48 }
 0x14c   : > { %v744_v56 = vpop.f32.mrf.mxu0 }
 0x14d   : > { %v941_v57 = vpop.f32.mrf.mxu1  ;;  %v4126_v58 = vadd.f32 %v2917_v50, %v768_v54  ;;  %v767_v40 = vadd.f32 %v744_v56, %v4096_v51 }
 0x14f   : > { %v4129_v59 = vadd.f32 %v941_v57, %v767_v40 }
 0x150   : > { %v2952_v0 = vpop.f32.mrf.mxu0 }
 0x151   : > { %4369 = vst [vmem:[#allocation2_spill] sm:$0xff] %v4129_v59  ;;  %v4131_v39 = vpop.f32.mrf.mxu1 }
 0x152   : > { %v1065_v2 = vpop.f32.mrf.mxu0 }
 0x153   : > { %v4133_v8 = vpop.f32.mrf.mxu1 }
 0x156   : > { %v4135_v5 = vpop.f32.mrf.mxu0 }
 0x157   : > { %v4137_v9 = vpop.f32.mrf.mxu1 }
 0x158   : > { %v4139_v10 = vpop.f32.mrf.mxu0 }
 0x159   : > { %v4141_v48 = vpop.f32.mrf.mxu1 }
 0x15c   : > { %v4143_v11 = vpop.f32.mrf.mxu0 }
 0x15d   : > { %v4145_v16 = vpop.f32.mrf.mxu1 }
 0x15e   : > { %v4147_v51 = vpop.f32.mrf.mxu0 }
 0x15f   : > { %v4149_v18 = vpop.f32.mrf.mxu1 }
 0x162   : > { %v4151_v25 = vpop.f32.mrf.mxu0 }
 0x163   : > { %v4153_v26 = vpop.f32.mrf.mxu1 }
 0x164   : > { %v4155_v24 = vpop.f32.mrf.mxu0 }
 0x165   : > { %v4157_v46 = vpop.f32.mrf.mxu1 }
 0x168   : > { %v2964_v47 = vpop.f32.mrf.mxu0 }
 0x169   : > { %v3020_v27 = vpop.f32.mrf.mxu1 }
 0x16a   : > { %v1105_v36 = vpop.f32.mrf.mxu0 }
 0x16b   : > { %v4159_v61 = vpop.f32.mrf.mxu1 }
 0x16e   : > { %v2967_v31 = vpop.f32.mrf.mxu0 }
 0x16f   : > { %v4161_v6 = vpop.f32.mrf.mxu1 }
 0x170   : > { %v1115_v41 = vpop.f32.mrf.mxu0 }
 0x171   : > { %v4163_v37 = vpop.f32.mrf.mxu1 }
 0x174   : > { %v4165_v23 = vpop.f32.mrf.mxu0 }
 0x175   : > { %v4167_v7 = vpop.f32.mrf.mxu1 }
 0x176   : > { %v4169_v43 = vpop.f32.mrf.mxu0 }
 0x177   : > { %v4171_v29 = vpop.f32.mrf.mxu1 }
 0x17a   : > { %v4173_v32 = vpop.f32.mrf.mxu0 }
 0x17b   : > { %4370 = vst [vmem:[#allocation3_spill] sm:$0xff] %v4173_v32  ;;  %v4175_v22 = vpop.f32.mrf.mxu1 }
 0x17c   : > { %4371 = vst [vmem:[#allocation4_spill] sm:$0xff] %v4175_v22  ;;  %v4177_v44 = vpop.f32.mrf.mxu0 }
 0x17d   : > { %4372 = vst [vmem:[#allocation5_spill] sm:$0xff] %v4177_v44  ;;  %v4179_v45 = vpop.f32.mrf.mxu1  ;;  %v1144_v44 = vadd.f32 %v1065_v2, %v4100_v3  ;;  %v1148_v3 = vadd.f32 %v4147_v51, %v4108_v60 }
 0x17e   : > { %4373 = vst [vmem:[#allocation6_spill] sm:$0xff] %v4179_v45 }
 0x17f   : > { %v1338_v2 = vadd.f32 %v4133_v8, %v1144_v44  ;;  %v1342_v51 = vadd.f32 %v4149_v18, %v1148_v3 }
 0x180   : > { %v3064_v28 = vpop.f32.mrf.mxu0 }
 0x181   : > { %v4181_v21 = vpop.f32.mrf.mxu1 }
 0x182   : > { %v1456_v53 = vpop.f32.mrf.mxu0 }
 0x183   : > { %v4183_v33 = vpop.f32.mrf.mxu1 }
 0x186   : > { %v4185_v42 = vpop.f32.mrf.mxu0 }
 0x187   : > { %v4187_v38 = vpop.f32.mrf.mxu1 }
 0x188   : > { %4374 = vst [vmem:[#allocation7_spill] sm:$0xff] %v4187_v38  ;;  %v4189_v35 = vpop.f32.mrf.mxu0 }
 0x189   : > { %v4191_v63 = vpop.f32.mrf.mxu1 }
 0x18a   : > { %4375 = vst [vmem:[#allocation8_spill] sm:$0xff] %v4191_v63 }
 0x18c   : > { %v4193_v4 = vpop.f32.mrf.mxu0 }
 0x18d   : > { %4376 = vst [vmem:[#allocation9_spill] sm:$0xff] %v4193_v4  ;;  %v4195_v52 = vpop.f32.mrf.mxu1 }
 0x18e   : > { %4377 = vst [vmem:[#allocation10_spill] sm:$0xff] %v4195_v52  ;;  %v4197_v49 = vpop.f32.mrf.mxu0 }
 0x18f   : > { %4378 = vst [vmem:[#allocation11_spill] sm:$0xff] %v4197_v49  ;;  %v4199_v50 = vpop.f32.mrf.mxu1 }
 0x190   : > { %4379 = vst [vmem:[#allocation12_spill] sm:$0xff] %v4199_v50 }
 0x192   : > { %v4201_v54 = vpop.f32.mrf.mxu0 }
 0x193   : > { %4380 = vst [vmem:[#allocation13_spill] sm:$0xff] %v4201_v54  ;;  %v4203_v56 = vpop.f32.mrf.mxu1 }
 0x194   : > { %4381 = vst [vmem:[#allocation14_spill] sm:$0xff] %v4203_v56  ;;  %v4205_v57 = vpop.f32.mrf.mxu0 }
 0x195   : > { %4382 = vst [vmem:[#allocation15_spill] sm:$0xff] %v4205_v57  ;;  %v4207_v40 = vpop.f32.mrf.mxu1  ;;  %v1153_v57 = vadd.f32 %v2964_v47, %v4114_v34  ;;  %v1149_v34 = vadd.f32 %v4143_v11, %v4106_v30  ;;  %v1154_v47 = vadd.f32 %v1115_v41, %v4120_v62  ;;  %v1150_v62 = vadd.f32 %v4155_v24, %v4112_v15 }
 0x196   : > { %4383 = vst [vmem:[#allocation16_spill] sm:$0xff] %v4207_v40  ;;  %v1145_v40 = vadd.f32 %v2952_v0, %v4098_v1  ;;  %v1156_v15 = vadd.f32 %v4169_v43, %v4124_v13 }
 0x197   : > { %v1347_v0 = vadd.f32 %v3020_v27, %v1153_v57  ;;  %v1344_v18 = vadd.f32 %v4157_v46, %v1150_v62 }
 0x198   : > { %v3076_v45 = vpop.f32.mrf.mxu0  ;;  %v1339_v1 = vadd.f32 %v4131_v39, %v1145_v40  ;;  %v1350_v46 = vadd.f32 %v4171_v29, %v1156_v15  ;;  %v4399_v15 = vld [vmem:[#allocation6_spill] sm:$0xff] }
 0x199   : > { %v3132_v22 = vpop.f32.mrf.mxu1  ;;  %v1544_v39 = vadd.f32 %v3076_v45, %v1347_v0 }
 0x19a   : > { %v1496_v38 = vpop.f32.mrf.mxu0  ;;  %v1536_v60 = vadd.f32 %v3064_v28, %v1339_v1  ;;  %v4388_v28 = vld [vmem:[#allocation2_spill] sm:$0xff] }
 0x19b   : > { %v1690_v63 = vpop.f32.mrf.mxu1 }
 0x19e   : > { %v3079_v4 = vpop.f32.mrf.mxu0 }
 0x19f   : > { %v4210_v52 = vpop.f32.mrf.mxu1 }
 0x1a0   : > { %4384 = vst [vmem:[#allocation17_spill] sm:$0xff] %v4210_v52  ;;  %v1506_v49 = vpop.f32.mrf.mxu0  ;;  %v1152_v52 = vadd.f32 %v1105_v36, %v4116_v20  ;;  %v1155_v20 = vadd.f32 %v2967_v31, %v4118_v55  ;;  %v1738_v31 = vadd.f32 %v3132_v22, %v1544_v39 }
 0x1a1   : > { %v4212_v50 = vpop.f32.mrf.mxu1 }
 0x1a2   : > { %4385 = vst [vmem:[#allocation18_spill] sm:$0xff] %v4212_v50  ;;  %v1147_v50 = vadd.f32 %v4135_v5, %v4102_v17  ;;  %v1346_v30 = vadd.f32 %v4159_v61, %v1152_v52  ;;  %v1157_v5 = vadd.f32 %v4165_v23, %v4122_v12  ;;  %v1730_v61 = vadd.f32 %v4181_v21, %v1536_v60  ;;  %v4389_v21 = vld [vmem:[#allocation5_spill] sm:$0xff]  ;;  %v4391_v52 = vld [vmem:[#allocation8_spill] sm:$0xff] }
 0x1a3   : > { %v4396_v60 = vld [vmem:[#allocation4_spill] sm:$0xff] }
 0x1a4   : > { %v4214_v54 = vpop.f32.mrf.mxu0  ;;  %v1341_v8 = vadd.f32 %v4137_v9, %v1147_v50  ;;  %v1543_v27 = vadd.f32 %v1496_v38, %v1346_v30  ;;  %v1349_v9 = vadd.f32 %v4161_v6, %v1155_v20  ;;  %v1351_v41 = vadd.f32 %v4167_v7, %v1157_v5  ;;  %v4387_v7 = vld [vmem:[#allocation3_spill] sm:$0xff] }
 0x1a5   : > { %v4216_v56 = vpop.f32.mrf.mxu1  ;;  %v1159_v45 = vadd.f32 %v4387_v7, %v4126_v58  ;;  %v4393_v58 = vld [vmem:[#allocation11_spill] sm:$0xff] }
 0x1a6   : > { %4386 = vst [vmem:[#allocation19_spill] sm:$0xff] %v4216_v56  ;;  %v4221_v59 = vpop.f32.mrf.mxu0  ;;  %v1146_v56 = vadd.f32 %v4139_v10, %v4104_v19  ;;  %v1151_v19 = vadd.f32 %v4151_v25, %v4110_v14  ;;  %v1343_v14 = vadd.f32 %v4145_v16, %v1149_v34  ;;  %v1535_v25 = vadd.f32 %v1456_v53, %v1338_v2 }
 0x1a7   : > { %v4223_v32 = vpop.f32.mrf.mxu1  ;;  %v1538_v12 = vadd.f32 %v4185_v42, %v1341_v8  ;;  %v1546_v23 = vadd.f32 %v3079_v4, %v1349_v9  ;;  %v1737_v43 = vadd.f32 %v1690_v63, %v1543_v27  ;;  %v1158_v53 = vadd.f32 %v4389_v21, %v4388_v28  ;;  %v4390_v42 = vld [vmem:[#allocation7_spill] sm:$0xff]  ;;  %v4394_v57 = vld [vmem:[#allocation17_spill] sm:$0xff] }
 0x1a8   : > { %v1340_v55 = vadd.f32 %v4141_v48, %v1146_v56  ;;  %v1348_v48 = vadd.f32 %v4163_v37, %v1154_v47  ;;  %v1345_v24 = vadd.f32 %v4153_v26, %v1151_v19  ;;  %v1729_v37 = vadd.f32 %v4183_v33, %v1535_v25  ;;  %v4392_v33 = vld [vmem:[#allocation9_spill] sm:$0xff] }
 0x1a9   : > { %v1732_v38 = vadd.f32 %v4390_v42, %v1538_v12  ;;  %v1540_v63 = vadd.f32 %v4392_v33, %v1343_v14  ;;  %v1539_v56 = vadd.f32 %v4393_v58, %v1342_v51  ;;  %v1740_v40 = vadd.f32 %v4394_v57, %v1546_v23  ;;  %v4395_v1 = vld [vmem:[#allocation18_spill] sm:$0xff]  ;;  %v4397_v8 = vld [vmem:[#allocation13_spill] sm:$0xff] }
 0x1aa   : > { %v4239_v36 = vpop.f32.mrf.mxu0  ;;  %v1537_v16 = vadd.f32 %v4189_v35, %v1340_v55  ;;  %v1545_v6 = vadd.f32 %v1506_v49, %v1348_v48  ;;  %v1548_v3 = vadd.f32 %v4214_v54, %v1351_v41  ;;  %v1353_v39 = vadd.f32 %v4396_v60, %v1159_v45  ;;  %v4398_v51 = vld [vmem:[#allocation10_spill] sm:$0xff] }
 0x1ab   : > { %v4241_v17 = vpop.f32.mrf.mxu1  ;;  %v1542_v55 = vadd.f32 %v4397_v8, %v1345_v24  ;;  %v1547_v62 = vadd.f32 %v4221_v59, %v1350_v46  ;;  %v1734_v25 = vadd.f32 %v4398_v51, %v1540_v63  ;;  %v1352_v12 = vadd.f32 %v4399_v15, %v1158_v53 }
 0x1ac   : > { %v4254_v10 = vpop.f32.mrf.mxu0  ;;  %v1731_v49 = vadd.f32 %v4391_v52, %v1537_v16  ;;  %v1739_v34 = vadd.f32 %v4395_v1, %v1545_v6  ;;  %v1550_v59 = vadd.f32 %v4239_v36, %v1353_v39  ;;  %v4402_v6 = vld [vmem:[#allocation12_spill] sm:$0xff] }
 0x1ad   : > { %v4256_v11 = vpop.f32.mrf.mxu1  ;;  %v4401_v24 = vld [vmem:[#allocation19_spill] sm:$0xff]  ;;  %v1741_v46 = vadd.f32 %v4223_v32, %v1547_v62  ;;  %v1549_v36 = vadd.f32 %v4254_v10, %v1352_v12 }
 0x1ae   : > { %v1744_v52 = vadd.f32 %v4241_v17, %v1550_v59 }
 0x1b0   : > { %v3176_v13 = vpop.f32.mrf.mxu0 }
 0x1b1   : > { %v3188_v26 = vpop.f32.mrf.mxu1  ;;  %v1924_v44 = vadd.f32 %v3176_v13, %v1730_v61  ;;  %v4400_v61 = vld [vmem:[#allocation15_spill] sm:$0xff]  ;;  %v1733_v13 = vadd.f32 %v4402_v6, %v1539_v56  ;;  %v1743_v56 = vadd.f32 %v4256_v11, %v1549_v36 }
 0x1b2   : > { %v4277_v22 = vadd.f32 %v3188_v26, %v1738_v31  ;;  %v1844_v35 = vpop.f32.mrf.mxu0  ;;  %v1541_v16 = vadd.f32 %v4400_v61, %v1344_v18  ;;  %v1742_v31 = vadd.f32 %v4401_v24, %v1548_v3 }
 0x1b3   : > { %v1884_v4 = vpop.f32.mrf.mxu1  ;;  %1940 = vst [vmem:[%s4274_s4 + $0x8] sm:$0xff] %v1924_v44  ;;  %v1923_v29 = vadd.f32 %v1844_v35, %v1729_v37  ;;  %v1978_v20 = vmul.f32 %v1924_v44, %v1924_v44  ;;  %v4404_v35 = vld [vmem:[#allocation16_spill] sm:$0xff] }
 0x1b4   : > { %1948 = vst [vmem:[%s4274_s4 + $0x48] sm:$0xff] %v4277_v22  ;;  %v4290_v50 = vadd.f32 %v1884_v4, %v1737_v43  ;;  %v3179_v0 = vpop.f32.mrf.mxu0  ;;  %v1735_v4 = vadd.f32 %v4404_v35, %v1541_v16  ;;  %v1986_v62 = vmul.f32 %v4277_v22, %v4277_v22 }
 0x1b5   : > { %v3191_v2 = vpop.f32.mrf.mxu1  ;;  %1939 = vst [vmem:[%s4274_s4] sm:$0xff] %v1923_v29  ;;  %v1955_v47 = vadd.f32 %v1924_v44, %v1923_v29  ;;  %v1977_v19 = vmul.f32 %v1923_v29, %v1923_v29  ;;  %v1926_v30 = vadd.f32 %v3179_v0, %v1732_v38  ;;  %v4403_v44 = vld [vmem:[#allocation14_spill] sm:$0xff] }
 0x1b6   : > { %1947 = vst [vmem:[%s4274_s4 + $0x40] sm:$0xff] %v4290_v50  ;;  %v4302_v5 = vadd.f32 %v3191_v2, %v1740_v40  ;;  %v1854_v54 = vpop.f32.mrf.mxu0  ;;  %v1736_v18 = vadd.f32 %v4403_v44, %v1542_v55  ;;  %v1985_v39 = vmul.f32 %v4290_v50, %v4290_v50 }
 0x1b7   : > { %v1894_v14 = vpop.f32.mrf.mxu1  ;;  %v1993_v27 = vadd.f32 %v1978_v20, %v1977_v19  ;;  %1942 = vst [vmem:[%s4274_s4 + $0x18] sm:$0xff] %v1926_v30  ;;  %v1925_v9 = vadd.f32 %v1854_v54, %v1731_v49  ;;  %v1980_v21 = vmul.f32 %v1926_v30, %v1926_v30 }
 0x1b8   : > { %v4306_v48 = vadd.f32 %v1894_v14, %v1739_v34  ;;  %1950 = vst [vmem:[%s4274_s4 + $0x58] sm:$0xff] %v4302_v5  ;;  %v3182_v41 = vpop.f32.mrf.mxu0 }
 0x1b9   : > { %v3194_v23 = vpop.f32.mrf.mxu1  ;;  %1941 = vst [vmem:[%s4274_s4 + $0x10] sm:$0xff] %v1925_v9  ;;  %v1956_v26 = vadd.f32 %v1955_v47, %v1925_v9  ;;  %v1979_v37 = vmul.f32 %v1925_v9, %v1925_v9  ;;  %v1928_v43 = vadd.f32 %v3182_v41, %v1734_v25  ;;  %v1988_v9 = vmul.f32 %v4302_v5, %v4302_v5 }
 0x1ba   : > { %1949 = vst [vmem:[%s4274_s4 + $0x50] sm:$0xff] %v4306_v48  ;;  %v1936_v7 = vadd.f32 %v3194_v23, %v1742_v31  ;;  %v1864_v45 = vpop.f32.mrf.mxu0  ;;  %v1987_v51 = vmul.f32 %v4306_v48, %v4306_v48 }
 0x1bb   : > { %v1904_v28 = vpop.f32.mrf.mxu1  ;;  %v1994_v53 = vadd.f32 %v1993_v27, %v1979_v37  ;;  %1944 = vst [vmem:[%s4274_s4 + $0x28] sm:$0xff] %v1928_v43  ;;  %v1927_v42 = vadd.f32 %v1864_v45, %v1733_v13  ;;  %v1957_v38 = vadd.f32 %v1956_v26, %v1926_v30  ;;  %v1982_v17 = vmul.f32 %v1928_v43, %v1928_v43 }
 0x1bc   : > { %1952 = vst [vmem:[%s4274_s4 + $0x68] sm:$0xff] %v1936_v7  ;;  %v1935_v49 = vadd.f32 %v1904_v28, %v1741_v46  ;;  %v3185_v32 = vpop.f32.mrf.mxu0  ;;  %v1990_v24 = vmul.f32 %v1936_v7, %v1936_v7 }
 0x1bd   : > { %v3197_v33 = vpop.f32.mrf.mxu1  ;;  %1943 = vst [vmem:[%s4274_s4 + $0x20] sm:$0xff] %v1927_v42  ;;  %v1958_v10 = vadd.f32 %v1957_v38, %v1927_v42  ;;  %v1981_v63 = vmul.f32 %v1927_v42, %v1927_v42  ;;  %v1995_v29 = vadd.f32 %v1994_v53, %v1980_v21  ;;  %v1930_v58 = vadd.f32 %v3185_v32, %v1736_v18 }
 0x1be   : > { %1951 = vst [vmem:[%s4274_s4 + $0x60] sm:$0xff] %v1935_v49  ;;  %v1938_v57 = vadd.f32 %v3197_v33, %v1744_v52  ;;  %v1874_v40 = vpop.f32.mrf.mxu0  ;;  %v1989_v12 = vmul.f32 %v1935_v49, %v1935_v49 }
 0x1bf   : > { %v1914_v1 = vpop.f32.mrf.mxu1  ;;  %v1996_v34 = vadd.f32 %v1995_v29, %v1981_v63  ;;  %1946 = vst [vmem:[%s4274_s4 + $0x38] sm:$0xff] %v1930_v58  ;;  %v1929_v3 = vadd.f32 %v1874_v40, %v1735_v4  ;;  %v1959_v0 = vadd.f32 %v1958_v10, %v1928_v43  ;;  %v1984_v30 = vmul.f32 %v1930_v58, %v1930_v58 }
 0x1c0   : > { %1954 = vst [vmem:[%s4274_s4 + $0x78] sm:$0xff] %v1938_v57  ;;  %v1937_v2 = vadd.f32 %v1914_v1, %v1743_v56  ;;  %v1992_v6 = vmul.f32 %v1938_v57, %v1938_v57 }
 0x1c1   : > { %1945 = vst [vmem:[%s4274_s4 + $0x30] sm:$0xff] %v1929_v3  ;;  %v1960_v20 = vadd.f32 %v1959_v0, %v1929_v3  ;;  %v1983_v47 = vmul.f32 %v1929_v3, %v1929_v3  ;;  %v1997_v19 = vadd.f32 %v1996_v34, %v1982_v17 }
 0x1c2   : > { %1953 = vst [vmem:[%s4274_s4 + $0x70] sm:$0xff] %v1937_v2  ;;  %v1991_v41 = vmul.f32 %v1937_v2, %v1937_v2 }
 0x1c3   : > { %v1961_v60 = vadd.f32 %v1960_v20, %v1930_v58  ;;  %v1998_v11 = vadd.f32 %v1997_v19, %v1983_v47 }
 0x1c5   : > { %v1962_v8 = vadd.f32 %v1961_v60, %v4290_v50  ;;  %v1999_v55 = vadd.f32 %v1998_v11, %v1984_v30 }
 0x1c7   : > { %v1963_v54 = vadd.f32 %v1962_v8, %v4277_v22  ;;  %v2000_v14 = vadd.f32 %v1999_v55, %v1985_v39 }
 0x1c9   : > { %v2001_v25 = vadd.f32 %v2000_v14, %v1986_v62  ;;  %v1964_v27 = vadd.f32 %v1963_v54, %v4306_v48 }
 0x1cb   : > { %v1965_v50 = vadd.f32 %v1964_v27, %v4302_v5  ;;  %v2002_v15 = vadd.f32 %v2001_v25, %v1987_v51 }
 0x1cd   : > { %v1966_v61 = vadd.f32 %v1965_v50, %v1935_v49  ;;  %v2003_v16 = vadd.f32 %v2002_v15, %v1988_v9 }
 0x1cf   : > { %v1967_v22 = vadd.f32 %v1966_v61, %v1936_v7  ;;  %v2004_v31 = vadd.f32 %v2003_v16, %v1989_v12 }
 0x1d1   : > { %v1968_v59 = vadd.f32 %v1967_v22, %v1937_v2  ;;  %v2005_v23 = vadd.f32 %v2004_v31, %v1990_v24 }
 0x1d3   : > { %v1969_v48 = vadd.f32 %v1968_v59, %v1938_v57  ;;  %v2006_v13 = vadd.f32 %v2005_v23, %v1991_v41 }
 0x1d5   : > { %v1970_v26 = vrot.slane %v1969_v48, 4  ;;  %v2007_v37 = vadd.f32 %v2006_v13, %v1992_v6 }
 0x1d7   : > { %v1971_v5 = vadd.f32 %v1970_v26, %v1969_v48  ;;  %v2008_v43 = vrot.slane %v2007_v37, 4 }
 0x1d9   : > { %v1972_v44 = vrot.slane %v1971_v5, 2  ;;  %v2009_v18 = vadd.f32 %v2008_v43, %v2007_v37 }
 0x1db   : > { %v1973_v46 = vadd.f32 %v1972_v44, %v1971_v5  ;;  %v2010_v36 = vrot.slane %v2009_v18, 2 }
 0x1dd   : > { %v1974_v7 = vrot.slane %v1973_v46, 1  ;;  %v2011_v45 = vadd.f32 %v2010_v36, %v2009_v18 }
 0x1df   : > { %v1975_v28 = vadd.f32 %v1974_v7, %v1973_v46  ;;  %v2012_v21 = vrot.slane %v2011_v45, 1 }
 0x1e1   : > { %1976 = vst [vmem:[%s216_s10] sm:$0x1] %v1975_v28  ;;  %v2013_v53 = vadd.f32 %v2012_v21, %v2011_v45 }
 0x1e3   : > { %2014 = vst [vmem:[%s216_s10 + $0x1] sm:$0x1] %v2013_v53 }
 0x1e4 PF: > { %s14_s16 = sadd.s32 1, %s3309_s16   ;;  %s4405_s12 = smov %s3301_s14 }
 0x1e5   : > { %p11_p8 = scmp.ge.s32.totalorder %s14_s16, 6   ;;  %s4406_s13 = smov %s3305_s15 }
 0x1e6   : > { %s4407_s14 = smov %s4410_s17  ;;  %s4408_s15 = smov %s4414_s18 }
 0x1e7   :  { %13 = sbr.rel (!%p11_p8) target bundleno = 3 (0x3), region = 81 }

</bundles_post_ra>
